<compile_context>
chip_gen: v5e
topology: v5e:2x2
jax: 0.10.0
libtpu: 0.0.40
codegen_flags: <defaults>
</compile_context>

<pallas_src>
import math

import jax
import jax.numpy as jnp
from jax.experimental import pallas as pl
from jax.experimental.pallas import tpu as pltpu

# ---- small synthetic BERT config ----
BATCH = 2
SEQ = 8
HIDDEN = 32
NUM_HEADS = 2
HEAD_DIM = HIDDEN // NUM_HEADS
INTERMEDIATE = 64
NUM_LAYERS = 2
VOCAB = 100
TYPE_VOCAB = 2
MAX_POS = 16
NUM_LABELS = 3
LN_EPS = 1e-12
LOGITS_PAD = 128          # lane-dense classifier output width (sliced to NUM_LABELS outside)

# ---- packed per-layer small-vector rows: one vector per sublane row, 128 lanes, f32 ----
ROW_BQ = 0                       # rows 0..NH-1   : q bias per head   (HEAD_DIM wide)
ROW_BK = NUM_HEADS               # rows NH..2NH-1 : k bias per head
ROW_BV = 2 * NUM_HEADS           # rows 2NH..3NH-1: v bias per head
ROW_BO = 3 * NUM_HEADS           # attention output bias (HIDDEN)
ROW_BI = ROW_BO + 1              # FFN intermediate bias (INTERMEDIATE)
ROW_BF = ROW_BO + 2              # FFN output bias (HIDDEN)
ROW_LN1G = ROW_BO + 3
ROW_LN1B = ROW_BO + 4
ROW_LN2G = ROW_BO + 5
ROW_LN2B = ROW_BO + 6
VEC_ROWS = 16                    # 13 rows used, padded to a sublane multiple of 8


def _layer_norm(x, g, b):
    mu = jnp.mean(x, axis=-1, keepdims=True)
    xc = x - mu
    var = jnp.mean(xc * xc, axis=-1, keepdims=True)
    return xc * jax.lax.rsqrt(var + LN_EPS) * g + b


def _gelu(x):
    # TODO(synk): HF "gelu" is erf-based; tanh approximation used for guaranteed TPU lowering.
    return jax.nn.gelu(x, approximate=True)


# ---------------- fused Pallas kernel (whole forward, no grid, layers unrolled) ----------------

def bert_fused_kernel(emb_ref, mask_ref, emb_g_ref, emb_b_ref,
                      wqkv_ref, wo_ref, wi_ref, wf_ref, vec_ref,
                      clsw_ref, clsb_ref,
                      logits_ref, x_sc):
    scale = 1.0 / math.sqrt(HEAD_DIM)
    mask = mask_ref[...]                                   # (B, 1, S) additive, broadcasts

    # Embedding LayerNorm (f32).
    x = _layer_norm(emb_ref[...], emb_g_ref[...], emb_b_ref[...])   # (B*S, H)

    # Statically unrolled encoder layers; all weights VMEM-resident, no grid / scratch carry.
    for l in range(NUM_LAYERS):
        vec = vec_ref[l]                                   # (VEC_ROWS, 128) f32 packed vectors
        x_bf = x.astype(jnp.bfloat16)

        # --- multi-head self-attention: per-head weights addressed by a leading axis ---
        attn = jnp.zeros((BATCH * SEQ, HIDDEN), jnp.float32)
        for h in range(NUM_HEADS):
            qh = (jnp.dot(x_bf, wqkv_ref[l, ROW_BQ + h],
                          preferred_element_type=jnp.float32)
                  + vec[ROW_BQ + h:ROW_BQ + h + 1, :HEAD_DIM])        # (B*S, D)
            kh = (jnp.dot(x_bf, wqkv_ref[l, ROW_BK + h],
                          preferred_element_type=jnp.float32)
                  + vec[ROW_BK + h:ROW_BK + h + 1, :HEAD_DIM])
            vh = (jnp.dot(x_bf, wqkv_ref[l, ROW_BV + h],
                          preferred_element_type=jnp.float32)
                  + vec[ROW_BV + h:ROW_BV + h + 1, :HEAD_DIM])

            q3 = qh.reshape(BATCH, SEQ, HEAD_DIM).astype(jnp.bfloat16)
            k3 = kh.reshape(BATCH, SEQ, HEAD_DIM).astype(jnp.bfloat16)
            v3 = vh.reshape(BATCH, SEQ, HEAD_DIM).astype(jnp.bfloat16)

            s = jnp.einsum('bqd,bkd->bqk', q3, k3,
                           preferred_element_type=jnp.float32) * scale + mask   # f32
            m = jnp.max(s, axis=-1, keepdims=True)
            p = jnp.exp(s - m)
            p = p * pl.reciprocal(jnp.sum(p, axis=-1, keepdims=True), approx=True)  # EUP slot
            ctx = jnp.einsum('bqk,bkd->bqd', p.astype(jnp.bfloat16), v3,
                             preferred_element_type=jnp.float32)                # (B, S, D)

            # Per-head output projection accumulated (replaces the lane-axis concatenate).
            attn = attn + jnp.dot(
                ctx.reshape(BATCH * SEQ, HEAD_DIM).astype(jnp.bfloat16),
                wo_ref[l, h], preferred_element_type=jnp.float32)

        attn = attn + vec[ROW_BO:ROW_BO + 1, :HIDDEN]
        h1 = _layer_norm(x + attn,
                         vec[ROW_LN1G:ROW_LN1G + 1, :HIDDEN],
                         vec[ROW_LN1B:ROW_LN1B + 1, :HIDDEN])

        # --- FFN + residual + LN2 (f32 elementwise, bf16 MXU) ---
        ff = _gelu(jnp.dot(h1.astype(jnp.bfloat16), wi_ref[l],
                           preferred_element_type=jnp.float32)
                   + vec[ROW_BI:ROW_BI + 1, :INTERMEDIATE])
        ff = (jnp.dot(ff.astype(jnp.bfloat16), wf_ref[l],
                      preferred_element_type=jnp.float32)
              + vec[ROW_BF:ROW_BF + 1, :HIDDEN])
        x = _layer_norm(h1 + ff,
                        vec[ROW_LN2G:ROW_LN2G + 1, :HIDDEN],
                        vec[ROW_LN2B:ROW_LN2B + 1, :HIDDEN])

    # [CLS] rows via a strided sublane read (rows 0 and SEQ) instead of reshape+[:,0,:] gather;
    # classifier output stays lane-dense (128 wide).
    x_sc[...] = x
    cls = x_sc[pl.ds(0, BATCH, stride=SEQ), :]                        # (B, H)
    logits_ref[...] = (jnp.dot(cls.astype(jnp.bfloat16), clsw_ref[...],
                               preferred_element_type=jnp.float32)
                       + clsb_ref[...])


# ---------------- wrapper ----------------

def fused_bert(emb2d, mask, p):
    args = (emb2d, mask, p['emb_ln_g'], p['emb_ln_b'],
            p['wqkv'], p['wo'], p['wi'], p['wf'], p['vecs'],
            p['cls_w'], p['cls_b'])
    return pl.pallas_call(
        bert_fused_kernel,
        out_shape=jax.ShapeDtypeStruct((BATCH, LOGITS_PAD), jnp.float32),
        in_specs=[pl.BlockSpec(memory_space=pltpu.MemorySpace.VMEM) for _ in args],
        out_specs=pl.BlockSpec(memory_space=pltpu.MemorySpace.VMEM),
        scratch_shapes=[pltpu.VMEM((BATCH * SEQ, HIDDEN), jnp.float32)],
    )(*args)


# ---------------- parameters ----------------

def init_params(key):
    keys = iter(jax.random.split(key, 32))

    def w(shape, scale=0.02):
        return jax.random.normal(next(keys), shape, jnp.float32) * scale

    L, H, I = NUM_LAYERS, HIDDEN, INTERMEDIATE
    NH, D = NUM_HEADS, HEAD_DIM

    # Fused QKV weight, conceptually (L, H, 3H) with columns [q | k | v], each [head0|head1].
    # Pre-permute so each head's projection is a leading-axis slab: (L, 3*NH, H, D).
    wqkv = (w((L, H, 3 * H))
            .reshape(L, H, 3, NH, D)
            .transpose(0, 2, 3, 1, 4)
            .reshape(L, 3 * NH, H, D)).astype(jnp.bfloat16)
    bqkv = w((L, 3 * H)).reshape(L, 3 * NH, D)             # same [q|k|v] x head row ordering

    wo = w((L, H, H)).reshape(L, NH, D, H).astype(jnp.bfloat16)   # per-head row blocks of (H,H)
    bo = w((L, H))

    wi = w((L, H, I)).astype(jnp.bfloat16)
    bi = w((L, I))
    wf = w((L, I, H)).astype(jnp.bfloat16)
    bf = w((L, H))

    # Packed per-layer small vectors: one vector per sublane row, zero-padded to 128 lanes.
    vecs = jnp.zeros((L, VEC_ROWS, 128), jnp.float32)
    vecs = vecs.at[:, ROW_BQ:ROW_BQ + 3 * NH, :D].set(bqkv)
    vecs = vecs.at[:, ROW_BO, :H].set(bo)
    vecs = vecs.at[:, ROW_BI, :I].set(bi)
    vecs = vecs.at[:, ROW_BF, :H].set(bf)
    vecs = vecs.at[:, ROW_LN1G, :H].set(jnp.ones((L, H), jnp.float32))
    vecs = vecs.at[:, ROW_LN1B, :H].set(jnp.zeros((L, H), jnp.float32))
    vecs = vecs.at[:, ROW_LN2G, :H].set(jnp.ones((L, H), jnp.float32))
    vecs = vecs.at[:, ROW_LN2B, :H].set(jnp.zeros((L, H), jnp.float32))

    cls_w = w((H, NUM_LABELS))
    cls_b = w((1, NUM_LABELS))

    params = {
        'word_emb': w((VOCAB, H)),
        'pos_emb': w((MAX_POS, H)),
        'type_emb': w((TYPE_VOCAB, H)),
        'emb_ln_g': jnp.ones((1, H), jnp.float32),
        'emb_ln_b': jnp.zeros((1, H), jnp.float32),
        'wqkv': wqkv, 'wo': wo, 'wi': wi, 'wf': wf, 'vecs': vecs,
        # lane-dense (128-wide, zero-padded) classifier
        'cls_w': jnp.zeros((H, LOGITS_PAD), jnp.float32)
                    .at[:, :NUM_LABELS].set(cls_w).astype(jnp.bfloat16),
        'cls_b': jnp.zeros((1, LOGITS_PAD), jnp.float32)
                    .at[:, :NUM_LABELS].set(cls_b),
    }
    return params


# ---------------- forward pass ----------------

def bert_classifier_forward(params, input_ids, attention_mask, token_type_ids=None):
    B, S = input_ids.shape
    if token_type_ids is None:
        token_type_ids = jnp.zeros_like(input_ids)

    # glue: data-dependent embedding-table gathers in plain JAX, summed once, fixed 2D layout
    we = jnp.take(params['word_emb'], input_ids, axis=0)                   # (B,S,H)
    pe = jnp.broadcast_to(params['pos_emb'][:S][None, :, :], (B, S, HIDDEN))
    te = jnp.take(params['type_emb'], token_type_ids, axis=0)              # (B,S,H)
    emb2d = (we + pe + te).reshape(B * S, HIDDEN)                          # (B*S, H)

    # HF-style extended additive attention mask, already in score-broadcast layout (B,1,S)
    ext_mask = (1.0 - attention_mask.astype(jnp.float32))[:, None, :] * -1e9

    logits_padded = fused_bert(emb2d, ext_mask, params)                    # (B, 128)
    return logits_padded[:, :NUM_LABELS]


if __name__ == "__main__":
    key = jax.random.PRNGKey(0)
    pkey, ikey = jax.random.split(key)

    params = init_params(pkey)

    input_ids = jax.random.randint(ikey, (BATCH, SEQ), 0, VOCAB, dtype=jnp.int32)
    # batch element 1 has two padding tokens at the end
    attention_mask = jnp.array([[1] * SEQ,
                                [1] * (SEQ - 2) + [0, 0]], dtype=jnp.int32)
    token_type_ids = jnp.zeros((BATCH, SEQ), dtype=jnp.int32)

    logits = bert_classifier_forward(params, input_ids, attention_mask, token_type_ids)
    logits = jax.block_until_ready(logits)
    assert logits.shape == (BATCH, NUM_LABELS) and logits.dtype == jnp.float32
    print("KERNEL_OK")
</pallas_src>

<mosaic_0001>
module attributes {stable_mosaic.version = 11 : i64} {
  func.func @bert_fused_kernel(%arg0: memref<16x32xf32, #tpu.memory_space<vmem>>, %arg1: memref<2x1x8xf32, #tpu.memory_space<vmem>>, %arg2: memref<1x32xf32, #tpu.memory_space<vmem>>, %arg3: memref<1x32xf32, #tpu.memory_space<vmem>>, %arg4: memref<2x6x32x16xbf16, #tpu.memory_space<vmem>>, %arg5: memref<2x2x16x32xbf16, #tpu.memory_space<vmem>>, %arg6: memref<2x32x64xbf16, #tpu.memory_space<vmem>>, %arg7: memref<2x64x32xbf16, #tpu.memory_space<vmem>>, %arg8: memref<2x16x128xf32, #tpu.memory_space<vmem>>, %arg9: memref<32x128xbf16, #tpu.memory_space<vmem>>, %arg10: memref<1x128xf32, #tpu.memory_space<vmem>>, %arg11: memref<2x128xf32, #tpu.memory_space<vmem>>, %arg12: memref<16x32xf32, #tpu.memory_space<vmem>>) attributes {dimension_semantics = [], scalar_prefetch = 0 : i64, scratch_operands = 1 : i64, tpu.core_type = #tpu.core_type<tc>} {
    %c0 = arith.constant 0 : index
    %c0_0 = arith.constant 0 : index
    %c0_1 = arith.constant 0 : index
    %0 = vector.load %arg1[%c0, %c0_0, %c0_1] : memref<2x1x8xf32, #tpu.memory_space<vmem>>, vector<2x1x8xf32>
    %c0_2 = arith.constant 0 : index
    %c0_3 = arith.constant 0 : index
    %1 = vector.load %arg0[%c0_2, %c0_3] : memref<16x32xf32, #tpu.memory_space<vmem>>, vector<16x32xf32>
    %c0_4 = arith.constant 0 : index
    %c0_5 = arith.constant 0 : index
    %2 = vector.load %arg2[%c0_4, %c0_5] : memref<1x32xf32, #tpu.memory_space<vmem>>, vector<1x32xf32>
    %c0_6 = arith.constant 0 : index
    %c0_7 = arith.constant 0 : index
    %3 = vector.load %arg3[%c0_6, %c0_7] : memref<1x32xf32, #tpu.memory_space<vmem>>, vector<1x32xf32>
    %cst = arith.constant dense<0.000000e+00> : vector<16xf32>
    %4 = vector.multi_reduction <add>, %1, %cst [1] : vector<16x32xf32> to vector<16xf32>
    %5 = vector.shape_cast %4 : vector<16xf32> to vector<16x1xf32>
    %cst_8 = arith.constant 3.200000e+01 : f32
    %6 = vector.broadcast %cst_8 : f32 to vector<16x1xf32>
    %7 = arith.divf %5, %6 : vector<16x1xf32>
    %8 = vector.broadcast %7 : vector<16x1xf32> to vector<16x32xf32>
    %9 = arith.subf %1, %8 : vector<16x32xf32>
    %10 = arith.mulf %9, %9 : vector<16x32xf32>
    %cst_9 = arith.constant dense<0.000000e+00> : vector<16xf32>
    %11 = vector.multi_reduction <add>, %10, %cst_9 [1] : vector<16x32xf32> to vector<16xf32>
    %12 = vector.shape_cast %11 : vector<16xf32> to vector<16x1xf32>
    %cst_10 = arith.constant 3.200000e+01 : f32
    %13 = vector.broadcast %cst_10 : f32 to vector<16x1xf32>
    %14 = arith.divf %12, %13 : vector<16x1xf32>
    %cst_11 = arith.constant 9.99999996E-13 : f32
    %15 = vector.broadcast %cst_11 : f32 to vector<16x1xf32>
    %16 = arith.addf %14, %15 : vector<16x1xf32>
    %17 = math.rsqrt %16 : vector<16x1xf32>
    %18 = vector.broadcast %17 : vector<16x1xf32> to vector<16x32xf32>
    %19 = arith.mulf %9, %18 : vector<16x32xf32>
    %20 = vector.broadcast %2 : vector<1x32xf32> to vector<16x32xf32>
    %21 = arith.mulf %19, %20 : vector<16x32xf32>
    %22 = vector.broadcast %3 : vector<1x32xf32> to vector<16x32xf32>
    %23 = arith.addf %21, %22 : vector<16x32xf32>
    %c0_12 = arith.constant 0 : index
    %c0_13 = arith.constant 0 : index
    %c0_14 = arith.constant 0 : index
    %24 = vector.load %arg8[%c0_12, %c0_13, %c0_14] : memref<2x16x128xf32, #tpu.memory_space<vmem>>, vector<1x16x128xf32>
    %25 = vector.shape_cast %24 : vector<1x16x128xf32> to vector<16x128xf32>
    %26 = arith.truncf %23 : vector<16x32xf32> to vector<16x32xbf16>
    %cst_15 = arith.constant 0.000000e+00 : f32
    %27 = vector.broadcast %cst_15 : f32 to vector<16x32xf32>
    %c0_16 = arith.constant 0 : index
    %c0_17 = arith.constant 0 : index
    %c0_18 = arith.constant 0 : index
    %c0_19 = arith.constant 0 : index
    %28 = vector.load %arg4[%c0_16, %c0_17, %c0_18, %c0_19] : memref<2x6x32x16xbf16, #tpu.memory_space<vmem>>, vector<1x1x32x16xbf16>
    %29 = vector.shape_cast %28 : vector<1x1x32x16xbf16> to vector<32x16xbf16>
    %cst_20 = arith.constant dense<0.000000e+00> : vector<16x16xf32>
    %30 = tpu.matmul %26, %29, %cst_20 {dimension_numbers = #tpu.dot_dimension_numbers<[1], [0], [0], [1], [0, 0, 1, 1], [], []>} : vector<16x32xbf16>, vector<32x16xbf16>, vector<16x16xf32> -> vector<16x16xf32>
    %31 = vector.extract_strided_slice %25 {offsets = [0, 0], sizes = [1, 16], strides = [1, 1]} : vector<16x128xf32> to vector<1x16xf32>
    %32 = vector.broadcast %31 : vector<1x16xf32> to vector<16x16xf32>
    %33 = arith.addf %30, %32 : vector<16x16xf32>
    %c0_21 = arith.constant 0 : index
    %c2 = arith.constant 2 : index
    %c0_22 = arith.constant 0 : index
    %c0_23 = arith.constant 0 : index
    %34 = vector.load %arg4[%c0_21, %c2, %c0_22, %c0_23] : memref<2x6x32x16xbf16, #tpu.memory_space<vmem>>, vector<1x1x32x16xbf16>
    %35 = vector.shape_cast %34 : vector<1x1x32x16xbf16> to vector<32x16xbf16>
    %cst_24 = arith.constant dense<0.000000e+00> : vector<16x16xf32>
    %36 = tpu.matmul %26, %35, %cst_24 {dimension_numbers = #tpu.dot_dimension_numbers<[1], [0], [0], [1], [0, 0, 1, 1], [], []>} : vector<16x32xbf16>, vector<32x16xbf16>, vector<16x16xf32> -> vector<16x16xf32>
    %37 = vector.extract_strided_slice %25 {offsets = [2, 0], sizes = [1, 16], strides = [1, 1]} : vector<16x128xf32> to vector<1x16xf32>
    %38 = vector.broadcast %37 : vector<1x16xf32> to vector<16x16xf32>
    %39 = arith.addf %36, %38 : vector<16x16xf32>
    %c0_25 = arith.constant 0 : index
    %c4 = arith.constant 4 : index
    %c0_26 = arith.constant 0 : index
    %c0_27 = arith.constant 0 : index
    %40 = vector.load %arg4[%c0_25, %c4, %c0_26, %c0_27] : memref<2x6x32x16xbf16, #tpu.memory_space<vmem>>, vector<1x1x32x16xbf16>
    %41 = vector.shape_cast %40 : vector<1x1x32x16xbf16> to vector<32x16xbf16>
    %cst_28 = arith.constant dense<0.000000e+00> : vector<16x16xf32>
    %42 = tpu.matmul %26, %41, %cst_28 {dimension_numbers = #tpu.dot_dimension_numbers<[1], [0], [0], [1], [0, 0, 1, 1], [], []>} : vector<16x32xbf16>, vector<32x16xbf16>, vector<16x16xf32> -> vector<16x16xf32>
    %43 = vector.extract_strided_slice %25 {offsets = [4, 0], sizes = [1, 16], strides = [1, 1]} : vector<16x128xf32> to vector<1x16xf32>
    %44 = vector.broadcast %43 : vector<1x16xf32> to vector<16x16xf32>
    %45 = arith.addf %42, %44 : vector<16x16xf32>
    %46 = vector.shape_cast %33 : vector<16x16xf32> to vector<2x8x16xf32>
    %47 = arith.truncf %46 : vector<2x8x16xf32> to vector<2x8x16xbf16>
    %48 = vector.shape_cast %39 : vector<16x16xf32> to vector<2x8x16xf32>
    %49 = arith.truncf %48 : vector<2x8x16xf32> to vector<2x8x16xbf16>
    %50 = vector.shape_cast %45 : vector<16x16xf32> to vector<2x8x16xf32>
    %51 = arith.truncf %50 : vector<2x8x16xf32> to vector<2x8x16xbf16>
    "tpu.trace_start"() <{level = 10 : i32, message = "bqd,bkd->bqk"}> : () -> ()
    %cst_29 = arith.constant dense<0.000000e+00> : vector<2x8x8xf32>
    %52 = tpu.matmul %47, %49, %cst_29 {dimension_numbers = #tpu.dot_dimension_numbers<[2], [2], [1], [1], [0, 0, 0, 1, 1, 1], [0], [0]>} : vector<2x8x16xbf16>, vector<2x8x16xbf16>, vector<2x8x8xf32> -> vector<2x8x8xf32>
    "tpu.trace_stop"() : () -> ()
    %cst_30 = arith.constant 2.500000e-01 : f32
    %53 = vector.broadcast %cst_30 : f32 to vector<2x8x8xf32>
    %54 = arith.mulf %52, %53 : vector<2x8x8xf32>
    %55 = vector.broadcast %0 : vector<2x1x8xf32> to vector<2x8x8xf32>
    %56 = arith.addf %54, %55 : vector<2x8x8xf32>
    %cst_31 = arith.constant dense<0xFF800000> : vector<2x8xf32>
    %57 = vector.multi_reduction <maximumf>, %56, %cst_31 [2] : vector<2x8x8xf32> to vector<2x8xf32>
    %58 = vector.shape_cast %57 : vector<2x8xf32> to vector<2x8x1xf32>
    %59 = vector.broadcast %58 : vector<2x8x1xf32> to vector<2x8x8xf32>
    %60 = arith.subf %56, %59 : vector<2x8x8xf32>
    %61 = math.exp %60 : vector<2x8x8xf32>
    %cst_32 = arith.constant dense<0.000000e+00> : vector<2x8xf32>
    %62 = vector.multi_reduction <add>, %61, %cst_32 [2] : vector<2x8x8xf32> to vector<2x8xf32>
    %63 = vector.shape_cast %62 : vector<2x8xf32> to vector<2x8x1xf32>
    %64 = tpu.reciprocal %63 {approx = true} : vector<2x8x1xf32> -> vector<2x8x1xf32>
    %65 = vector.broadcast %64 : vector<2x8x1xf32> to vector<2x8x8xf32>
    %66 = arith.mulf %61, %65 : vector<2x8x8xf32>
    %67 = arith.truncf %66 : vector<2x8x8xf32> to vector<2x8x8xbf16>
    "tpu.trace_start"() <{level = 10 : i32, message = "bqk,bkd->bqd"}> : () -> ()
    %cst_33 = arith.constant dense<0.000000e+00> : vector<2x8x16xf32>
    %68 = tpu.matmul %67, %51, %cst_33 {dimension_numbers = #tpu.dot_dimension_numbers<[2], [1], [1], [2], [0, 0, 0, 1, 1, 2], [0], [0]>} : vector<2x8x8xbf16>, vector<2x8x16xbf16>, vector<2x8x16xf32> -> vector<2x8x16xf32>
    "tpu.trace_stop"() : () -> ()
    %69 = vector.shape_cast %68 : vector<2x8x16xf32> to vector<16x16xf32>
    %70 = arith.truncf %69 : vector<16x16xf32> to vector<16x16xbf16>
    %c0_34 = arith.constant 0 : index
    %c0_35 = arith.constant 0 : index
    %c0_36 = arith.constant 0 : index
    %c0_37 = arith.constant 0 : index
    %71 = vector.load %arg5[%c0_34, %c0_35, %c0_36, %c0_37] : memref<2x2x16x32xbf16, #tpu.memory_space<vmem>>, vector<1x1x16x32xbf16>
    %72 = vector.shape_cast %71 : vector<1x1x16x32xbf16> to vector<16x32xbf16>
    %cst_38 = arith.constant dense<0.000000e+00> : vector<16x32xf32>
    %73 = tpu.matmul %70, %72, %cst_38 {dimension_numbers = #tpu.dot_dimension_numbers<[1], [0], [0], [1], [0, 0, 1, 1], [], []>} : vector<16x16xbf16>, vector<16x32xbf16>, vector<16x32xf32> -> vector<16x32xf32>
    %74 = arith.addf %27, %73 : vector<16x32xf32>
    %c0_39 = arith.constant 0 : index
    %c1 = arith.constant 1 : index
    %c0_40 = arith.constant 0 : index
    %c0_41 = arith.constant 0 : index
    %75 = vector.load %arg4[%c0_39, %c1, %c0_40, %c0_41] : memref<2x6x32x16xbf16, #tpu.memory_space<vmem>>, vector<1x1x32x16xbf16>
    %76 = vector.shape_cast %75 : vector<1x1x32x16xbf16> to vector<32x16xbf16>
    %cst_42 = arith.constant dense<0.000000e+00> : vector<16x16xf32>
    %77 = tpu.matmul %26, %76, %cst_42 {dimension_numbers = #tpu.dot_dimension_numbers<[1], [0], [0], [1], [0, 0, 1, 1], [], []>} : vector<16x32xbf16>, vector<32x16xbf16>, vector<16x16xf32> -> vector<16x16xf32>
    %78 = vector.extract_strided_slice %25 {offsets = [1, 0], sizes = [1, 16], strides = [1, 1]} : vector<16x128xf32> to vector<1x16xf32>
    %79 = vector.broadcast %78 : vector<1x16xf32> to vector<16x16xf32>
    %80 = arith.addf %77, %79 : vector<16x16xf32>
    %c0_43 = arith.constant 0 : index
    %c3 = arith.constant 3 : index
    %c0_44 = arith.constant 0 : index
    %c0_45 = arith.constant 0 : index
    %81 = vector.load %arg4[%c0_43, %c3, %c0_44, %c0_45] : memref<2x6x32x16xbf16, #tpu.memory_space<vmem>>, vector<1x1x32x16xbf16>
    %82 = vector.shape_cast %81 : vector<1x1x32x16xbf16> to vector<32x16xbf16>
    %cst_46 = arith.constant dense<0.000000e+00> : vector<16x16xf32>
    %83 = tpu.matmul %26, %82, %cst_46 {dimension_numbers = #tpu.dot_dimension_numbers<[1], [0], [0], [1], [0, 0, 1, 1], [], []>} : vector<16x32xbf16>, vector<32x16xbf16>, vector<16x16xf32> -> vector<16x16xf32>
    %84 = vector.extract_strided_slice %25 {offsets = [3, 0], sizes = [1, 16], strides = [1, 1]} : vector<16x128xf32> to vector<1x16xf32>
    %85 = vector.broadcast %84 : vector<1x16xf32> to vector<16x16xf32>
    %86 = arith.addf %83, %85 : vector<16x16xf32>
    %c0_47 = arith.constant 0 : index
    %c5 = arith.constant 5 : index
    %c0_48 = arith.constant 0 : index
    %c0_49 = arith.constant 0 : index
    %87 = vector.load %arg4[%c0_47, %c5, %c0_48, %c0_49] : memref<2x6x32x16xbf16, #tpu.memory_space<vmem>>, vector<1x1x32x16xbf16>
    %88 = vector.shape_cast %87 : vector<1x1x32x16xbf16> to vector<32x16xbf16>
    %cst_50 = arith.constant dense<0.000000e+00> : vector<16x16xf32>
    %89 = tpu.matmul %26, %88, %cst_50 {dimension_numbers = #tpu.dot_dimension_numbers<[1], [0], [0], [1], [0, 0, 1, 1], [], []>} : vector<16x32xbf16>, vector<32x16xbf16>, vector<16x16xf32> -> vector<16x16xf32>
    %90 = vector.extract_strided_slice %25 {offsets = [5, 0], sizes = [1, 16], strides = [1, 1]} : vector<16x128xf32> to vector<1x16xf32>
    %91 = vector.broadcast %90 : vector<1x16xf32> to vector<16x16xf32>
    %92 = arith.addf %89, %91 : vector<16x16xf32>
    %93 = vector.shape_cast %80 : vector<16x16xf32> to vector<2x8x16xf32>
    %94 = arith.truncf %93 : vector<2x8x16xf32> to vector<2x8x16xbf16>
    %95 = vector.shape_cast %86 : vector<16x16xf32> to vector<2x8x16xf32>
    %96 = arith.truncf %95 : vector<2x8x16xf32> to vector<2x8x16xbf16>
    %97 = vector.shape_cast %92 : vector<16x16xf32> to vector<2x8x16xf32>
    %98 = arith.truncf %97 : vector<2x8x16xf32> to vector<2x8x16xbf16>
    "tpu.trace_start"() <{level = 10 : i32, message = "bqd,bkd->bqk"}> : () -> ()
    %cst_51 = arith.constant dense<0.000000e+00> : vector<2x8x8xf32>
    %99 = tpu.matmul %94, %96, %cst_51 {dimension_numbers = #tpu.dot_dimension_numbers<[2], [2], [1], [1], [0, 0, 0, 1, 1, 1], [0], [0]>} : vector<2x8x16xbf16>, vector<2x8x16xbf16>, vector<2x8x8xf32> -> vector<2x8x8xf32>
    "tpu.trace_stop"() : () -> ()
    %cst_52 = arith.constant 2.500000e-01 : f32
    %100 = vector.broadcast %cst_52 : f32 to vector<2x8x8xf32>
    %101 = arith.mulf %99, %100 : vector<2x8x8xf32>
    %102 = vector.broadcast %0 : vector<2x1x8xf32> to vector<2x8x8xf32>
    %103 = arith.addf %101, %102 : vector<2x8x8xf32>
    %cst_53 = arith.constant dense<0xFF800000> : vector<2x8xf32>
    %104 = vector.multi_reduction <maximumf>, %103, %cst_53 [2] : vector<2x8x8xf32> to vector<2x8xf32>
    %105 = vector.shape_cast %104 : vector<2x8xf32> to vector<2x8x1xf32>
    %106 = vector.broadcast %105 : vector<2x8x1xf32> to vector<2x8x8xf32>
    %107 = arith.subf %103, %106 : vector<2x8x8xf32>
    %108 = math.exp %107 : vector<2x8x8xf32>
    %cst_54 = arith.constant dense<0.000000e+00> : vector<2x8xf32>
    %109 = vector.multi_reduction <add>, %108, %cst_54 [2] : vector<2x8x8xf32> to vector<2x8xf32>
    %110 = vector.shape_cast %109 : vector<2x8xf32> to vector<2x8x1xf32>
    %111 = tpu.reciprocal %110 {approx = true} : vector<2x8x1xf32> -> vector<2x8x1xf32>
    %112 = vector.broadcast %111 : vector<2x8x1xf32> to vector<2x8x8xf32>
    %113 = arith.mulf %108, %112 : vector<2x8x8xf32>
    %114 = arith.truncf %113 : vector<2x8x8xf32> to vector<2x8x8xbf16>
    "tpu.trace_start"() <{level = 10 : i32, message = "bqk,bkd->bqd"}> : () -> ()
    %cst_55 = arith.constant dense<0.000000e+00> : vector<2x8x16xf32>
    %115 = tpu.matmul %114, %98, %cst_55 {dimension_numbers = #tpu.dot_dimension_numbers<[2], [1], [1], [2], [0, 0, 0, 1, 1, 2], [0], [0]>} : vector<2x8x8xbf16>, vector<2x8x16xbf16>, vector<2x8x16xf32> -> vector<2x8x16xf32>
    "tpu.trace_stop"() : () -> ()
    %116 = vector.shape_cast %115 : vector<2x8x16xf32> to vector<16x16xf32>
    %117 = arith.truncf %116 : vector<16x16xf32> to vector<16x16xbf16>
    %c0_56 = arith.constant 0 : index
    %c1_57 = arith.constant 1 : index
    %c0_58 = arith.constant 0 : index
    %c0_59 = arith.constant 0 : index
    %118 = vector.load %arg5[%c0_56, %c1_57, %c0_58, %c0_59] : memref<2x2x16x32xbf16, #tpu.memory_space<vmem>>, vector<1x1x16x32xbf16>
    %119 = vector.shape_cast %118 : vector<1x1x16x32xbf16> to vector<16x32xbf16>
    %cst_60 = arith.constant dense<0.000000e+00> : vector<16x32xf32>
    %120 = tpu.matmul %117, %119, %cst_60 {dimension_numbers = #tpu.dot_dimension_numbers<[1], [0], [0], [1], [0, 0, 1, 1], [], []>} : vector<16x16xbf16>, vector<16x32xbf16>, vector<16x32xf32> -> vector<16x32xf32>
    %121 = arith.addf %74, %120 : vector<16x32xf32>
    %122 = vector.extract_strided_slice %25 {offsets = [6, 0], sizes = [1, 32], strides = [1, 1]} : vector<16x128xf32> to vector<1x32xf32>
    %123 = vector.broadcast %122 : vector<1x32xf32> to vector<16x32xf32>
    %124 = arith.addf %121, %123 : vector<16x32xf32>
    %125 = arith.addf %23, %124 : vector<16x32xf32>
    %126 = vector.extract_strided_slice %25 {offsets = [9, 0], sizes = [1, 32], strides = [1, 1]} : vector<16x128xf32> to vector<1x32xf32>
    %127 = vector.extract_strided_slice %25 {offsets = [10, 0], sizes = [1, 32], strides = [1, 1]} : vector<16x128xf32> to vector<1x32xf32>
    %cst_61 = arith.constant dense<0.000000e+00> : vector<16xf32>
    %128 = vector.multi_reduction <add>, %125, %cst_61 [1] : vector<16x32xf32> to vector<16xf32>
    %129 = vector.shape_cast %128 : vector<16xf32> to vector<16x1xf32>
    %cst_62 = arith.constant 3.200000e+01 : f32
    %130 = vector.broadcast %cst_62 : f32 to vector<16x1xf32>
    %131 = arith.divf %129, %130 : vector<16x1xf32>
    %132 = vector.broadcast %131 : vector<16x1xf32> to vector<16x32xf32>
    %133 = arith.subf %125, %132 : vector<16x32xf32>
    %134 = arith.mulf %133, %133 : vector<16x32xf32>
    %cst_63 = arith.constant dense<0.000000e+00> : vector<16xf32>
    %135 = vector.multi_reduction <add>, %134, %cst_63 [1] : vector<16x32xf32> to vector<16xf32>
    %136 = vector.shape_cast %135 : vector<16xf32> to vector<16x1xf32>
    %cst_64 = arith.constant 3.200000e+01 : f32
    %137 = vector.broadcast %cst_64 : f32 to vector<16x1xf32>
    %138 = arith.divf %136, %137 : vector<16x1xf32>
    %cst_65 = arith.constant 9.99999996E-13 : f32
    %139 = vector.broadcast %cst_65 : f32 to vector<16x1xf32>
    %140 = arith.addf %138, %139 : vector<16x1xf32>
    %141 = math.rsqrt %140 : vector<16x1xf32>
    %142 = vector.broadcast %141 : vector<16x1xf32> to vector<16x32xf32>
    %143 = arith.mulf %133, %142 : vector<16x32xf32>
    %144 = vector.broadcast %126 : vector<1x32xf32> to vector<16x32xf32>
    %145 = arith.mulf %143, %144 : vector<16x32xf32>
    %146 = vector.broadcast %127 : vector<1x32xf32> to vector<16x32xf32>
    %147 = arith.addf %145, %146 : vector<16x32xf32>
    %148 = arith.truncf %147 : vector<16x32xf32> to vector<16x32xbf16>
    %c0_66 = arith.constant 0 : index
    %c0_67 = arith.constant 0 : index
    %c0_68 = arith.constant 0 : index
    %149 = vector.load %arg6[%c0_66, %c0_67, %c0_68] : memref<2x32x64xbf16, #tpu.memory_space<vmem>>, vector<1x32x64xbf16>
    %150 = vector.shape_cast %149 : vector<1x32x64xbf16> to vector<32x64xbf16>
    %cst_69 = arith.constant dense<0.000000e+00> : vector<16x64xf32>
    %151 = tpu.matmul %148, %150, %cst_69 {dimension_numbers = #tpu.dot_dimension_numbers<[1], [0], [0], [1], [0, 0, 1, 1], [], []>} : vector<16x32xbf16>, vector<32x64xbf16>, vector<16x64xf32> -> vector<16x64xf32>
    %152 = vector.extract_strided_slice %25 {offsets = [7, 0], sizes = [1, 64], strides = [1, 1]} : vector<16x128xf32> to vector<1x64xf32>
    %153 = vector.broadcast %152 : vector<1x64xf32> to vector<16x64xf32>
    %154 = arith.addf %151, %153 : vector<16x64xf32>
    %155 = arith.mulf %154, %154 : vector<16x64xf32>
    %156 = arith.mulf %154, %155 : vector<16x64xf32>
    %cst_70 = arith.constant 4.471500e-02 : f32
    %157 = vector.broadcast %cst_70 : f32 to vector<16x64xf32>
    %158 = arith.mulf %157, %156 : vector<16x64xf32>
    %159 = arith.addf %154, %158 : vector<16x64xf32>
    %cst_71 = arith.constant 0.797884583 : f32
    %160 = vector.broadcast %cst_71 : f32 to vector<16x64xf32>
    %161 = arith.mulf %160, %159 : vector<16x64xf32>
    %162 = math.tanh %161 : vector<16x64xf32>
    %cst_72 = arith.constant 1.000000e+00 : f32
    %163 = vector.broadcast %cst_72 : f32 to vector<16x64xf32>
    %164 = arith.addf %163, %162 : vector<16x64xf32>
    %cst_73 = arith.constant 5.000000e-01 : f32
    %165 = vector.broadcast %cst_73 : f32 to vector<16x64xf32>
    %166 = arith.mulf %165, %164 : vector<16x64xf32>
    %167 = arith.mulf %154, %166 : vector<16x64xf32>
    %168 = arith.truncf %167 : vector<16x64xf32> to vector<16x64xbf16>
    %c0_74 = arith.constant 0 : index
    %c0_75 = arith.constant 0 : index
    %c0_76 = arith.constant 0 : index
    %169 = vector.load %arg7[%c0_74, %c0_75, %c0_76] : memref<2x64x32xbf16, #tpu.memory_space<vmem>>, vector<1x64x32xbf16>
    %170 = vector.shape_cast %169 : vector<1x64x32xbf16> to vector<64x32xbf16>
    %cst_77 = arith.constant dense<0.000000e+00> : vector<16x32xf32>
    %171 = tpu.matmul %168, %170, %cst_77 {dimension_numbers = #tpu.dot_dimension_numbers<[1], [0], [0], [1], [0, 0, 1, 1], [], []>} : vector<16x64xbf16>, vector<64x32xbf16>, vector<16x32xf32> -> vector<16x32xf32>
    %172 = vector.extract_strided_slice %25 {offsets = [8, 0], sizes = [1, 32], strides = [1, 1]} : vector<16x128xf32> to vector<1x32xf32>
    %173 = vector.broadcast %172 : vector<1x32xf32> to vector<16x32xf32>
    %174 = arith.addf %171, %173 : vector<16x32xf32>
    %175 = arith.addf %147, %174 : vector<16x32xf32>
    %176 = vector.extract_strided_slice %25 {offsets = [11, 0], sizes = [1, 32], strides = [1, 1]} : vector<16x128xf32> to vector<1x32xf32>
    %177 = vector.extract_strided_slice %25 {offsets = [12, 0], sizes = [1, 32], strides = [1, 1]} : vector<16x128xf32> to vector<1x32xf32>
    %cst_78 = arith.constant dense<0.000000e+00> : vector<16xf32>
    %178 = vector.multi_reduction <add>, %175, %cst_78 [1] : vector<16x32xf32> to vector<16xf32>
    %179 = vector.shape_cast %178 : vector<16xf32> to vector<16x1xf32>
    %cst_79 = arith.constant 3.200000e+01 : f32
    %180 = vector.broadcast %cst_79 : f32 to vector<16x1xf32>
    %181 = arith.divf %179, %180 : vector<16x1xf32>
    %182 = vector.broadcast %181 : vector<16x1xf32> to vector<16x32xf32>
    %183 = arith.subf %175, %182 : vector<16x32xf32>
    %184 = arith.mulf %183, %183 : vector<16x32xf32>
    %cst_80 = arith.constant dense<0.000000e+00> : vector<16xf32>
    %185 = vector.multi_reduction <add>, %184, %cst_80 [1] : vector<16x32xf32> to vector<16xf32>
    %186 = vector.shape_cast %185 : vector<16xf32> to vector<16x1xf32>
    %cst_81 = arith.constant 3.200000e+01 : f32
    %187 = vector.broadcast %cst_81 : f32 to vector<16x1xf32>
    %188 = arith.divf %186, %187 : vector<16x1xf32>
    %cst_82 = arith.constant 9.99999996E-13 : f32
    %189 = vector.broadcast %cst_82 : f32 to vector<16x1xf32>
    %190 = arith.addf %188, %189 : vector<16x1xf32>
    %191 = math.rsqrt %190 : vector<16x1xf32>
    %192 = vector.broadcast %191 : vector<16x1xf32> to vector<16x32xf32>
    %193 = arith.mulf %183, %192 : vector<16x32xf32>
    %194 = vector.broadcast %176 : vector<1x32xf32> to vector<16x32xf32>
    %195 = arith.mulf %193, %194 : vector<16x32xf32>
    %196 = vector.broadcast %177 : vector<1x32xf32> to vector<16x32xf32>
    %197 = arith.addf %195, %196 : vector<16x32xf32>
    %c1_83 = arith.constant 1 : index
    %c0_84 = arith.constant 0 : index
    %c0_85 = arith.constant 0 : index
    %198 = vector.load %arg8[%c1_83, %c0_84, %c0_85] : memref<2x16x128xf32, #tpu.memory_space<vmem>>, vector<1x16x128xf32>
    %199 = vector.shape_cast %198 : vector<1x16x128xf32> to vector<16x128xf32>
    %200 = arith.truncf %197 : vector<16x32xf32> to vector<16x32xbf16>
    %cst_86 = arith.constant 0.000000e+00 : f32
    %201 = vector.broadcast %cst_86 : f32 to vector<16x32xf32>
    %c1_87 = arith.constant 1 : index
    %c0_88 = arith.constant 0 : index
    %c0_89 = arith.constant 0 : index
    %c0_90 = arith.constant 0 : index
    %202 = vector.load %arg4[%c1_87, %c0_88, %c0_89, %c0_90] : memref<2x6x32x16xbf16, #tpu.memory_space<vmem>>, vector<1x1x32x16xbf16>
    %203 = vector.shape_cast %202 : vector<1x1x32x16xbf16> to vector<32x16xbf16>
    %cst_91 = arith.constant dense<0.000000e+00> : vector<16x16xf32>
    %204 = tpu.matmul %200, %203, %cst_91 {dimension_numbers = #tpu.dot_dimension_numbers<[1], [0], [0], [1], [0, 0, 1, 1], [], []>} : vector<16x32xbf16>, vector<32x16xbf16>, vector<16x16xf32> -> vector<16x16xf32>
    %205 = vector.extract_strided_slice %199 {offsets = [0, 0], sizes = [1, 16], strides = [1, 1]} : vector<16x128xf32> to vector<1x16xf32>
    %206 = vector.broadcast %205 : vector<1x16xf32> to vector<16x16xf32>
    %207 = arith.addf %204, %206 : vector<16x16xf32>
    %c1_92 = arith.constant 1 : index
    %c2_93 = arith.constant 2 : index
    %c0_94 = arith.constant 0 : index
    %c0_95 = arith.constant 0 : index
    %208 = vector.load %arg4[%c1_92, %c2_93, %c0_94, %c0_95] : memref<2x6x32x16xbf16, #tpu.memory_space<vmem>>, vector<1x1x32x16xbf16>
    %209 = vector.shape_cast %208 : vector<1x1x32x16xbf16> to vector<32x16xbf16>
    %cst_96 = arith.constant dense<0.000000e+00> : vector<16x16xf32>
    %210 = tpu.matmul %200, %209, %cst_96 {dimension_numbers = #tpu.dot_dimension_numbers<[1], [0], [0], [1], [0, 0, 1, 1], [], []>} : vector<16x32xbf16>, vector<32x16xbf16>, vector<16x16xf32> -> vector<16x16xf32>
    %211 = vector.extract_strided_slice %199 {offsets = [2, 0], sizes = [1, 16], strides = [1, 1]} : vector<16x128xf32> to vector<1x16xf32>
    %212 = vector.broadcast %211 : vector<1x16xf32> to vector<16x16xf32>
    %213 = arith.addf %210, %212 : vector<16x16xf32>
    %c1_97 = arith.constant 1 : index
    %c4_98 = arith.constant 4 : index
    %c0_99 = arith.constant 0 : index
    %c0_100 = arith.constant 0 : index
    %214 = vector.load %arg4[%c1_97, %c4_98, %c0_99, %c0_100] : memref<2x6x32x16xbf16, #tpu.memory_space<vmem>>, vector<1x1x32x16xbf16>
    %215 = vector.shape_cast %214 : vector<1x1x32x16xbf16> to vector<32x16xbf16>
    %cst_101 = arith.constant dense<0.000000e+00> : vector<16x16xf32>
    %216 = tpu.matmul %200, %215, %cst_101 {dimension_numbers = #tpu.dot_dimension_numbers<[1], [0], [0], [1], [0, 0, 1, 1], [], []>} : vector<16x32xbf16>, vector<32x16xbf16>, vector<16x16xf32> -> vector<16x16xf32>
    %217 = vector.extract_strided_slice %199 {offsets = [4, 0], sizes = [1, 16], strides = [1, 1]} : vector<16x128xf32> to vector<1x16xf32>
    %218 = vector.broadcast %217 : vector<1x16xf32> to vector<16x16xf32>
    %219 = arith.addf %216, %218 : vector<16x16xf32>
    %220 = vector.shape_cast %207 : vector<16x16xf32> to vector<2x8x16xf32>
    %221 = arith.truncf %220 : vector<2x8x16xf32> to vector<2x8x16xbf16>
    %222 = vector.shape_cast %213 : vector<16x16xf32> to vector<2x8x16xf32>
    %223 = arith.truncf %222 : vector<2x8x16xf32> to vector<2x8x16xbf16>
    %224 = vector.shape_cast %219 : vector<16x16xf32> to vector<2x8x16xf32>
    %225 = arith.truncf %224 : vector<2x8x16xf32> to vector<2x8x16xbf16>
    "tpu.trace_start"() <{level = 10 : i32, message = "bqd,bkd->bqk"}> : () -> ()
    %cst_102 = arith.constant dense<0.000000e+00> : vector<2x8x8xf32>
    %226 = tpu.matmul %221, %223, %cst_102 {dimension_numbers = #tpu.dot_dimension_numbers<[2], [2], [1], [1], [0, 0, 0, 1, 1, 1], [0], [0]>} : vector<2x8x16xbf16>, vector<2x8x16xbf16>, vector<2x8x8xf32> -> vector<2x8x8xf32>
    "tpu.trace_stop"() : () -> ()
    %cst_103 = arith.constant 2.500000e-01 : f32
    %227 = vector.broadcast %cst_103 : f32 to vector<2x8x8xf32>
    %228 = arith.mulf %226, %227 : vector<2x8x8xf32>
    %229 = vector.broadcast %0 : vector<2x1x8xf32> to vector<2x8x8xf32>
    %230 = arith.addf %228, %229 : vector<2x8x8xf32>
    %cst_104 = arith.constant dense<0xFF800000> : vector<2x8xf32>
    %231 = vector.multi_reduction <maximumf>, %230, %cst_104 [2] : vector<2x8x8xf32> to vector<2x8xf32>
    %232 = vector.shape_cast %231 : vector<2x8xf32> to vector<2x8x1xf32>
    %233 = vector.broadcast %232 : vector<2x8x1xf32> to vector<2x8x8xf32>
    %234 = arith.subf %230, %233 : vector<2x8x8xf32>
    %235 = math.exp %234 : vector<2x8x8xf32>
    %cst_105 = arith.constant dense<0.000000e+00> : vector<2x8xf32>
    %236 = vector.multi_reduction <add>, %235, %cst_105 [2] : vector<2x8x8xf32> to vector<2x8xf32>
    %237 = vector.shape_cast %236 : vector<2x8xf32> to vector<2x8x1xf32>
    %238 = tpu.reciprocal %237 {approx = true} : vector<2x8x1xf32> -> vector<2x8x1xf32>
    %239 = vector.broadcast %238 : vector<2x8x1xf32> to vector<2x8x8xf32>
    %240 = arith.mulf %235, %239 : vector<2x8x8xf32>
    %241 = arith.truncf %240 : vector<2x8x8xf32> to vector<2x8x8xbf16>
    "tpu.trace_start"() <{level = 10 : i32, message = "bqk,bkd->bqd"}> : () -> ()
    %cst_106 = arith.constant dense<0.000000e+00> : vector<2x8x16xf32>
    %242 = tpu.matmul %241, %225, %cst_106 {dimension_numbers = #tpu.dot_dimension_numbers<[2], [1], [1], [2], [0, 0, 0, 1, 1, 2], [0], [0]>} : vector<2x8x8xbf16>, vector<2x8x16xbf16>, vector<2x8x16xf32> -> vector<2x8x16xf32>
    "tpu.trace_stop"() : () -> ()
    %243 = vector.shape_cast %242 : vector<2x8x16xf32> to vector<16x16xf32>
    %244 = arith.truncf %243 : vector<16x16xf32> to vector<16x16xbf16>
    %c1_107 = arith.constant 1 : index
    %c0_108 = arith.constant 0 : index
    %c0_109 = arith.constant 0 : index
    %c0_110 = arith.constant 0 : index
    %245 = vector.load %arg5[%c1_107, %c0_108, %c0_109, %c0_110] : memref<2x2x16x32xbf16, #tpu.memory_space<vmem>>, vector<1x1x16x32xbf16>
    %246 = vector.shape_cast %245 : vector<1x1x16x32xbf16> to vector<16x32xbf16>
    %cst_111 = arith.constant dense<0.000000e+00> : vector<16x32xf32>
    %247 = tpu.matmul %244, %246, %cst_111 {dimension_numbers = #tpu.dot_dimension_numbers<[1], [0], [0], [1], [0, 0, 1, 1], [], []>} : vector<16x16xbf16>, vector<16x32xbf16>, vector<16x32xf32> -> vector<16x32xf32>
    %248 = arith.addf %201, %247 : vector<16x32xf32>
    %c1_112 = arith.constant 1 : index
    %c1_113 = arith.constant 1 : index
    %c0_114 = arith.constant 0 : index
    %c0_115 = arith.constant 0 : index
    %249 = vector.load %arg4[%c1_112, %c1_113, %c0_114, %c0_115] : memref<2x6x32x16xbf16, #tpu.memory_space<vmem>>, vector<1x1x32x16xbf16>
    %250 = vector.shape_cast %249 : vector<1x1x32x16xbf16> to vector<32x16xbf16>
    %cst_116 = arith.constant dense<0.000000e+00> : vector<16x16xf32>
    %251 = tpu.matmul %200, %250, %cst_116 {dimension_numbers = #tpu.dot_dimension_numbers<[1], [0], [0], [1], [0, 0, 1, 1], [], []>} : vector<16x32xbf16>, vector<32x16xbf16>, vector<16x16xf32> -> vector<16x16xf32>
    %252 = vector.extract_strided_slice %199 {offsets = [1, 0], sizes = [1, 16], strides = [1, 1]} : vector<16x128xf32> to vector<1x16xf32>
    %253 = vector.broadcast %252 : vector<1x16xf32> to vector<16x16xf32>
    %254 = arith.addf %251, %253 : vector<16x16xf32>
    %c1_117 = arith.constant 1 : index
    %c3_118 = arith.constant 3 : index
    %c0_119 = arith.constant 0 : index
    %c0_120 = arith.constant 0 : index
    %255 = vector.load %arg4[%c1_117, %c3_118, %c0_119, %c0_120] : memref<2x6x32x16xbf16, #tpu.memory_space<vmem>>, vector<1x1x32x16xbf16>
    %256 = vector.shape_cast %255 : vector<1x1x32x16xbf16> to vector<32x16xbf16>
    %cst_121 = arith.constant dense<0.000000e+00> : vector<16x16xf32>
    %257 = tpu.matmul %200, %256, %cst_121 {dimension_numbers = #tpu.dot_dimension_numbers<[1], [0], [0], [1], [0, 0, 1, 1], [], []>} : vector<16x32xbf16>, vector<32x16xbf16>, vector<16x16xf32> -> vector<16x16xf32>
    %258 = vector.extract_strided_slice %199 {offsets = [3, 0], sizes = [1, 16], strides = [1, 1]} : vector<16x128xf32> to vector<1x16xf32>
    %259 = vector.broadcast %258 : vector<1x16xf32> to vector<16x16xf32>
    %260 = arith.addf %257, %259 : vector<16x16xf32>
    %c1_122 = arith.constant 1 : index
    %c5_123 = arith.constant 5 : index
    %c0_124 = arith.constant 0 : index
    %c0_125 = arith.constant 0 : index
    %261 = vector.load %arg4[%c1_122, %c5_123, %c0_124, %c0_125] : memref<2x6x32x16xbf16, #tpu.memory_space<vmem>>, vector<1x1x32x16xbf16>
    %262 = vector.shape_cast %261 : vector<1x1x32x16xbf16> to vector<32x16xbf16>
    %cst_126 = arith.constant dense<0.000000e+00> : vector<16x16xf32>
    %263 = tpu.matmul %200, %262, %cst_126 {dimension_numbers = #tpu.dot_dimension_numbers<[1], [0], [0], [1], [0, 0, 1, 1], [], []>} : vector<16x32xbf16>, vector<32x16xbf16>, vector<16x16xf32> -> vector<16x16xf32>
    %264 = vector.extract_strided_slice %199 {offsets = [5, 0], sizes = [1, 16], strides = [1, 1]} : vector<16x128xf32> to vector<1x16xf32>
    %265 = vector.broadcast %264 : vector<1x16xf32> to vector<16x16xf32>
    %266 = arith.addf %263, %265 : vector<16x16xf32>
    %267 = vector.shape_cast %254 : vector<16x16xf32> to vector<2x8x16xf32>
    %268 = arith.truncf %267 : vector<2x8x16xf32> to vector<2x8x16xbf16>
    %269 = vector.shape_cast %260 : vector<16x16xf32> to vector<2x8x16xf32>
    %270 = arith.truncf %269 : vector<2x8x16xf32> to vector<2x8x16xbf16>
    %271 = vector.shape_cast %266 : vector<16x16xf32> to vector<2x8x16xf32>
    %272 = arith.truncf %271 : vector<2x8x16xf32> to vector<2x8x16xbf16>
    "tpu.trace_start"() <{level = 10 : i32, message = "bqd,bkd->bqk"}> : () -> ()
    %cst_127 = arith.constant dense<0.000000e+00> : vector<2x8x8xf32>
    %273 = tpu.matmul %268, %270, %cst_127 {dimension_numbers = #tpu.dot_dimension_numbers<[2], [2], [1], [1], [0, 0, 0, 1, 1, 1], [0], [0]>} : vector<2x8x16xbf16>, vector<2x8x16xbf16>, vector<2x8x8xf32> -> vector<2x8x8xf32>
    "tpu.trace_stop"() : () -> ()
    %cst_128 = arith.constant 2.500000e-01 : f32
    %274 = vector.broadcast %cst_128 : f32 to vector<2x8x8xf32>
    %275 = arith.mulf %273, %274 : vector<2x8x8xf32>
    %276 = vector.broadcast %0 : vector<2x1x8xf32> to vector<2x8x8xf32>
    %277 = arith.addf %275, %276 : vector<2x8x8xf32>
    %cst_129 = arith.constant dense<0xFF800000> : vector<2x8xf32>
    %278 = vector.multi_reduction <maximumf>, %277, %cst_129 [2] : vector<2x8x8xf32> to vector<2x8xf32>
    %279 = vector.shape_cast %278 : vector<2x8xf32> to vector<2x8x1xf32>
    %280 = vector.broadcast %279 : vector<2x8x1xf32> to vector<2x8x8xf32>
    %281 = arith.subf %277, %280 : vector<2x8x8xf32>
    %282 = math.exp %281 : vector<2x8x8xf32>
    %cst_130 = arith.constant dense<0.000000e+00> : vector<2x8xf32>
    %283 = vector.multi_reduction <add>, %282, %cst_130 [2] : vector<2x8x8xf32> to vector<2x8xf32>
    %284 = vector.shape_cast %283 : vector<2x8xf32> to vector<2x8x1xf32>
    %285 = tpu.reciprocal %284 {approx = true} : vector<2x8x1xf32> -> vector<2x8x1xf32>
    %286 = vector.broadcast %285 : vector<2x8x1xf32> to vector<2x8x8xf32>
    %287 = arith.mulf %282, %286 : vector<2x8x8xf32>
    %288 = arith.truncf %287 : vector<2x8x8xf32> to vector<2x8x8xbf16>
    "tpu.trace_start"() <{level = 10 : i32, message = "bqk,bkd->bqd"}> : () -> ()
    %cst_131 = arith.constant dense<0.000000e+00> : vector<2x8x16xf32>
    %289 = tpu.matmul %288, %272, %cst_131 {dimension_numbers = #tpu.dot_dimension_numbers<[2], [1], [1], [2], [0, 0, 0, 1, 1, 2], [0], [0]>} : vector<2x8x8xbf16>, vector<2x8x16xbf16>, vector<2x8x16xf32> -> vector<2x8x16xf32>
    "tpu.trace_stop"() : () -> ()
    %290 = vector.shape_cast %289 : vector<2x8x16xf32> to vector<16x16xf32>
    %291 = arith.truncf %290 : vector<16x16xf32> to vector<16x16xbf16>
    %c1_132 = arith.constant 1 : index
    %c1_133 = arith.constant 1 : index
    %c0_134 = arith.constant 0 : index
    %c0_135 = arith.constant 0 : index
    %292 = vector.load %arg5[%c1_132, %c1_133, %c0_134, %c0_135] : memref<2x2x16x32xbf16, #tpu.memory_space<vmem>>, vector<1x1x16x32xbf16>
    %293 = vector.shape_cast %292 : vector<1x1x16x32xbf16> to vector<16x32xbf16>
    %cst_136 = arith.constant dense<0.000000e+00> : vector<16x32xf32>
    %294 = tpu.matmul %291, %293, %cst_136 {dimension_numbers = #tpu.dot_dimension_numbers<[1], [0], [0], [1], [0, 0, 1, 1], [], []>} : vector<16x16xbf16>, vector<16x32xbf16>, vector<16x32xf32> -> vector<16x32xf32>
    %295 = arith.addf %248, %294 : vector<16x32xf32>
    %296 = vector.extract_strided_slice %199 {offsets = [6, 0], sizes = [1, 32], strides = [1, 1]} : vector<16x128xf32> to vector<1x32xf32>
    %297 = vector.broadcast %296 : vector<1x32xf32> to vector<16x32xf32>
    %298 = arith.addf %295, %297 : vector<16x32xf32>
    %299 = arith.addf %197, %298 : vector<16x32xf32>
    %300 = vector.extract_strided_slice %199 {offsets = [9, 0], sizes = [1, 32], strides = [1, 1]} : vector<16x128xf32> to vector<1x32xf32>
    %301 = vector.extract_strided_slice %199 {offsets = [10, 0], sizes = [1, 32], strides = [1, 1]} : vector<16x128xf32> to vector<1x32xf32>
    %cst_137 = arith.constant dense<0.000000e+00> : vector<16xf32>
    %302 = vector.multi_reduction <add>, %299, %cst_137 [1] : vector<16x32xf32> to vector<16xf32>
    %303 = vector.shape_cast %302 : vector<16xf32> to vector<16x1xf32>
    %cst_138 = arith.constant 3.200000e+01 : f32
    %304 = vector.broadcast %cst_138 : f32 to vector<16x1xf32>
    %305 = arith.divf %303, %304 : vector<16x1xf32>
    %306 = vector.broadcast %305 : vector<16x1xf32> to vector<16x32xf32>
    %307 = arith.subf %299, %306 : vector<16x32xf32>
    %308 = arith.mulf %307, %307 : vector<16x32xf32>
    %cst_139 = arith.constant dense<0.000000e+00> : vector<16xf32>
    %309 = vector.multi_reduction <add>, %308, %cst_139 [1] : vector<16x32xf32> to vector<16xf32>
    %310 = vector.shape_cast %309 : vector<16xf32> to vector<16x1xf32>
    %cst_140 = arith.constant 3.200000e+01 : f32
    %311 = vector.broadcast %cst_140 : f32 to vector<16x1xf32>
    %312 = arith.divf %310, %311 : vector<16x1xf32>
    %cst_141 = arith.constant 9.99999996E-13 : f32
    %313 = vector.broadcast %cst_141 : f32 to vector<16x1xf32>
    %314 = arith.addf %312, %313 : vector<16x1xf32>
    %315 = math.rsqrt %314 : vector<16x1xf32>
    %316 = vector.broadcast %315 : vector<16x1xf32> to vector<16x32xf32>
    %317 = arith.mulf %307, %316 : vector<16x32xf32>
    %318 = vector.broadcast %300 : vector<1x32xf32> to vector<16x32xf32>
    %319 = arith.mulf %317, %318 : vector<16x32xf32>
    %320 = vector.broadcast %301 : vector<1x32xf32> to vector<16x32xf32>
    %321 = arith.addf %319, %320 : vector<16x32xf32>
    %322 = arith.truncf %321 : vector<16x32xf32> to vector<16x32xbf16>
    %c1_142 = arith.constant 1 : index
    %c0_143 = arith.constant 0 : index
    %c0_144 = arith.constant 0 : index
    %323 = vector.load %arg6[%c1_142, %c0_143, %c0_144] : memref<2x32x64xbf16, #tpu.memory_space<vmem>>, vector<1x32x64xbf16>
    %324 = vector.shape_cast %323 : vector<1x32x64xbf16> to vector<32x64xbf16>
    %cst_145 = arith.constant dense<0.000000e+00> : vector<16x64xf32>
    %325 = tpu.matmul %322, %324, %cst_145 {dimension_numbers = #tpu.dot_dimension_numbers<[1], [0], [0], [1], [0, 0, 1, 1], [], []>} : vector<16x32xbf16>, vector<32x64xbf16>, vector<16x64xf32> -> vector<16x64xf32>
    %326 = vector.extract_strided_slice %199 {offsets = [7, 0], sizes = [1, 64], strides = [1, 1]} : vector<16x128xf32> to vector<1x64xf32>
    %327 = vector.broadcast %326 : vector<1x64xf32> to vector<16x64xf32>
    %328 = arith.addf %325, %327 : vector<16x64xf32>
    %329 = arith.mulf %328, %328 : vector<16x64xf32>
    %330 = arith.mulf %328, %329 : vector<16x64xf32>
    %cst_146 = arith.constant 4.471500e-02 : f32
    %331 = vector.broadcast %cst_146 : f32 to vector<16x64xf32>
    %332 = arith.mulf %331, %330 : vector<16x64xf32>
    %333 = arith.addf %328, %332 : vector<16x64xf32>
    %cst_147 = arith.constant 0.797884583 : f32
    %334 = vector.broadcast %cst_147 : f32 to vector<16x64xf32>
    %335 = arith.mulf %334, %333 : vector<16x64xf32>
    %336 = math.tanh %335 : vector<16x64xf32>
    %cst_148 = arith.constant 1.000000e+00 : f32
    %337 = vector.broadcast %cst_148 : f32 to vector<16x64xf32>
    %338 = arith.addf %337, %336 : vector<16x64xf32>
    %cst_149 = arith.constant 5.000000e-01 : f32
    %339 = vector.broadcast %cst_149 : f32 to vector<16x64xf32>
    %340 = arith.mulf %339, %338 : vector<16x64xf32>
    %341 = arith.mulf %328, %340 : vector<16x64xf32>
    %342 = arith.truncf %341 : vector<16x64xf32> to vector<16x64xbf16>
    %c1_150 = arith.constant 1 : index
    %c0_151 = arith.constant 0 : index
    %c0_152 = arith.constant 0 : index
    %343 = vector.load %arg7[%c1_150, %c0_151, %c0_152] : memref<2x64x32xbf16, #tpu.memory_space<vmem>>, vector<1x64x32xbf16>
    %344 = vector.shape_cast %343 : vector<1x64x32xbf16> to vector<64x32xbf16>
    %cst_153 = arith.constant dense<0.000000e+00> : vector<16x32xf32>
    %345 = tpu.matmul %342, %344, %cst_153 {dimension_numbers = #tpu.dot_dimension_numbers<[1], [0], [0], [1], [0, 0, 1, 1], [], []>} : vector<16x64xbf16>, vector<64x32xbf16>, vector<16x32xf32> -> vector<16x32xf32>
    %346 = vector.extract_strided_slice %199 {offsets = [8, 0], sizes = [1, 32], strides = [1, 1]} : vector<16x128xf32> to vector<1x32xf32>
    %347 = vector.broadcast %346 : vector<1x32xf32> to vector<16x32xf32>
    %348 = arith.addf %345, %347 : vector<16x32xf32>
    %349 = arith.addf %321, %348 : vector<16x32xf32>
    %350 = vector.extract_strided_slice %199 {offsets = [11, 0], sizes = [1, 32], strides = [1, 1]} : vector<16x128xf32> to vector<1x32xf32>
    %351 = vector.extract_strided_slice %199 {offsets = [12, 0], sizes = [1, 32], strides = [1, 1]} : vector<16x128xf32> to vector<1x32xf32>
    %cst_154 = arith.constant dense<0.000000e+00> : vector<16xf32>
    %352 = vector.multi_reduction <add>, %349, %cst_154 [1] : vector<16x32xf32> to vector<16xf32>
    %353 = vector.shape_cast %352 : vector<16xf32> to vector<16x1xf32>
    %cst_155 = arith.constant 3.200000e+01 : f32
    %354 = vector.broadcast %cst_155 : f32 to vector<16x1xf32>
    %355 = arith.divf %353, %354 : vector<16x1xf32>
    %356 = vector.broadcast %355 : vector<16x1xf32> to vector<16x32xf32>
    %357 = arith.subf %349, %356 : vector<16x32xf32>
    %358 = arith.mulf %357, %357 : vector<16x32xf32>
    %cst_156 = arith.constant dense<0.000000e+00> : vector<16xf32>
    %359 = vector.multi_reduction <add>, %358, %cst_156 [1] : vector<16x32xf32> to vector<16xf32>
    %360 = vector.shape_cast %359 : vector<16xf32> to vector<16x1xf32>
    %cst_157 = arith.constant 3.200000e+01 : f32
    %361 = vector.broadcast %cst_157 : f32 to vector<16x1xf32>
    %362 = arith.divf %360, %361 : vector<16x1xf32>
    %cst_158 = arith.constant 9.99999996E-13 : f32
    %363 = vector.broadcast %cst_158 : f32 to vector<16x1xf32>
    %364 = arith.addf %362, %363 : vector<16x1xf32>
    %365 = math.rsqrt %364 : vector<16x1xf32>
    %366 = vector.broadcast %365 : vector<16x1xf32> to vector<16x32xf32>
    %367 = arith.mulf %357, %366 : vector<16x32xf32>
    %368 = vector.broadcast %350 : vector<1x32xf32> to vector<16x32xf32>
    %369 = arith.mulf %367, %368 : vector<16x32xf32>
    %370 = vector.broadcast %351 : vector<1x32xf32> to vector<16x32xf32>
    %371 = arith.addf %369, %370 : vector<16x32xf32>
    %c0_159 = arith.constant 0 : index
    %c0_160 = arith.constant 0 : index
    %372 = vector.load %arg12[%c0_159, %c0_160] : memref<16x32xf32, #tpu.memory_space<vmem>>, vector<16x32xf32>
    tpu.vector_store %arg12[%c0_159, %c0_160], %371 {strides = array<i32>} : memref<16x32xf32, #tpu.memory_space<vmem>>, vector<16x32xf32>,
    %c0_161 = arith.constant 0 : index
    %c0_162 = arith.constant 0 : index
    %373 = tpu.strided_load %arg12[%c0_161, %c0_162] {strides = array<i32: 8, 1>} : memref<16x32xf32, #tpu.memory_space<vmem>>, vector<2x32xf32>
    %374 = arith.truncf %373 : vector<2x32xf32> to vector<2x32xbf16>
    %c0_163 = arith.constant 0 : index
    %c0_164 = arith.constant 0 : index
    %375 = vector.load %arg9[%c0_163, %c0_164] : memref<32x128xbf16, #tpu.memory_space<vmem>>, vector<32x128xbf16>
    %cst_165 = arith.constant dense<0.000000e+00> : vector<2x128xf32>
    %376 = tpu.matmul %374, %375, %cst_165 {dimension_numbers = #tpu.dot_dimension_numbers<[1], [0], [0], [1], [0, 0, 1, 1], [], []>} : vector<2x32xbf16>, vector<32x128xbf16>, vector<2x128xf32> -> vector<2x128xf32>
    %c0_166 = arith.constant 0 : index
    %c0_167 = arith.constant 0 : index
    %377 = vector.load %arg10[%c0_166, %c0_167] : memref<1x128xf32, #tpu.memory_space<vmem>>, vector<1x128xf32>
    %378 = vector.broadcast %377 : vector<1x128xf32> to vector<2x128xf32>
    %379 = arith.addf %376, %378 : vector<2x128xf32>
    %c0_168 = arith.constant 0 : index
    %c0_169 = arith.constant 0 : index
    %380 = vector.load %arg11[%c0_168, %c0_169] : memref<2x128xf32, #tpu.memory_space<vmem>>, vector<2x128xf32>
    tpu.vector_store %arg11[%c0_168, %c0_169], %379 {strides = array<i32>} : memref<2x128xf32, #tpu.memory_space<vmem>>, vector<2x128xf32>,
    return
  }
}

</mosaic_0001>

<bundles_post_ra>
// kernel: tpu_custom_call.1
= control target key start
LH: loop header
LB: loop body
LE: loop exit
PB: predicated region body
PF: predicated region fallthrough
CT: control target
= control target key end

     0   :  { %vm46_vm0 = vcmask 261120   ;;  %s2363_s0 = inlined_call_operand.vmem [shape: f32[16,32], index: 0, kind: input, shape index: {}]   ;;  %s2364_s1 = inlined_call_operand.vmem [shape: f32[2,1,8], index: 1, kind: input, shape index: {}]   ;;  %s2365_s2 = inlined_call_operand.vmem [shape: f32[1,32], index: 2, kind: input, shape index: {}]   ;;  %s2366_s3 = inlined_call_operand.vmem [shape: f32[1,32], index: 3, kind: input, shape index: {}]   ;;  %s2367_s4 = inlined_call_operand.vmem [shape: bf16[2,6,32,16], index: 4, kind: input, shape index: {}]   ;;  %s2368_s5 = inlined_call_operand.vmem [shape: bf16[2,2,16,32], index: 5, kind: input, shape index: {}]   ;;  %s2369_s6 = inlined_call_operand.vmem [shape: bf16[2,32,64], index: 6, kind: input, shape index: {}]   ;;  %s2370_s7 = inlined_call_operand.vmem [shape: bf16[2,64,32], index: 7, kind: input, shape index: {}]   ;;  %s2371_s8 = inlined_call_operand.vmem [shape: f32[2,16,128], index: 8, kind: input, shape index: {}]   ;;  %s2372_s9 = inlined_call_operand.vmem [shape: bf16[32,128], index: 9, kind: input, shape index: {}]   ;;  %s2373_s10 = inlined_call_operand.vmem [shape: f32[1,128], index: 10, kind: input, shape index: {}]   ;;  %s2374_s11 = inlined_call_operand.hbm [shape: f32[2,128], index: 11, kind: output, shape index: {}]  }
   0x1   :  { %v42_v0 = vld [vmem:[%s2363_s0] sm:$0xff] }
   0x2   :  { %v47_v1 = vsel %vm46_vm0, %v42_v0, 0.0 }
   0x3   :  { %48 = vadd.xlane.f32.xlu0 %v47_v1 }
   0x4   :  { %16 = vsyncpa [#allocation4], 0  ;;  %v43_v2 = vld [vmem:[%s2363_s0 + $0x8] sm:$0xff]  ;;  %v1948_v4 = vmov 32.0   ;;  %v1811_v26 = vld [vmem:[%s2367_s4] sm:$0xff]  ;;  %vm215_vm8 = vcmask 130048  }
   0x5   :  { %v50_v3 = vsel %vm46_vm0, %v43_v2, 0.0  ;;  %1860 = vrcp.f32 %v1948_v4  ;;  %v1812_v21 = vld [vmem:[%s2367_s4 + $0x8] sm:$0xff]  ;;  %v1813_v27 = vld [vmem:[%s2367_s4 + $0x20] sm:$0xff]  ;;  %v1819_v63 = vld [vmem:[%s2367_s4 + $0x18] sm:$0xff]  ;;  %vm292_vm9 = vcmask 1043456   ;;  %vm264_vm10 = vcmask 64512  }
   0x6   :  { %v1814_v22 = vld [vmem:[%s2367_s4 + $0x28] sm:$0xff]  ;;  %137 = vmatpush.bf16.msra.mxu0 %v1812_v21  ;;  %v1815_v28 = vld [vmem:[%s2367_s4 + $0x40] sm:$0xff]  ;;  %v1818_v4 = vld [vmem:[%s2367_s4 + $0x10] sm:$0xff]  ;;  %s1949_s25 = smov [#allocation3]   ;;  %s1533_s28 = sshll.u32 %s2374_s11, 4  ;;  %s1534_s28 = int_to_ptr.hbm [resolvable:$true] %s1533_s28 }
   0x7   :  { %v1816_v23 = vld [vmem:[%s2367_s4 + $0x48] sm:$0xff]  ;;  %169 = vmatpush.bf16.msra.mxu1 %v1814_v22  ;;  %v1855_v45 = vld [vmem:[%s2365_s2] ss:$0 sm:$0xff]  ;;  %s1531_s26 = sshll.u32 %s1949_s25, 4  ;;  %s1532_s26 = int_to_ptr.vmem [resolvable:$true] %s1531_s26 }
   0x8   :  { %201 = vmatpush.bf16.msra.mxu2 %v1816_v23  ;;  %v1856_v49 = vld [vmem:[%s2366_s3] ss:$0 sm:$0xff] }
   0x9   :  { %v2067_v56 = vld [vmem:[%s2371_s8] sm:$0xff] }
   0xa   :  { %138 = vmatpush.bf16.msra.mxu0 %v1811_v26  ;;  %v150_v57 = vperm.slane %v2067_v56, 2  ;;  %v115_v61 = vperm.slane %v2067_v56, 0  ;;  %v2097_v23 = vld [vmem:[%s2364_s1] ss:$0 sm:$0xff]  ;;  %v2102_v26 = vld [vmem:[%s2364_s1 + $0x1] ss:$0 sm:$0xff] }
   0xb   :  { %51 = vadd.xlane.f32.xlu0 %v50_v3  ;;  %v1861_v5 = vpop.eup %1860  ;;  %170 = vmatpush.bf16.msra.mxu1 %v1813_v27 }
   0xc   :  { %v54_v6 = vmul.f32 32.0, %v1861_v5  ;;  %vm58_vm1 = vweird.f32 %v1861_v5  ;;  %202 = vmatpush.bf16.msra.mxu2 %v1815_v28 }
   0xe   :  { %v55_v7 = vsub.f32 1.0, %v54_v6 }
  0x10   :  { %v56_v8 = vmul.f32 %v1861_v5, %v55_v7 }
  0x12   :  { %v57_v9 = vadd.f32 %v1861_v5, %v56_v8 }
  0x14   :  { %v2018_v10 = vsel %vm58_vm1, %v1861_v5, %v57_v9 }
  0x76   :  { %v49_v11 = vpop.xlane.xlu0 %48 }
  0x77   :  { %v60_v12 = vmul.f32 %v2018_v10, %v49_v11 }
  0x79   :  { %v62_v13 = vsub.f32 %v42_v0, %v60_v12  ;;  %v182_v0 = vperm.slane %v2067_v56, 4  ;;  %v1821_v12 = vld [vmem:[%s2367_s4 + $0x38] sm:$0xff] }
  0x7b   :  { %v64_v14 = vmul.f32 %v62_v13, %v62_v13 }
  0x7d   :  { %v66_v15 = vsel %vm46_vm0, %v64_v14, 0.0 }
  0x7e   :  { %67 = vadd.xlane.f32.xlu1 %v66_v15  ;;  %v52_v16 = vpop.xlane.xlu0 %51 }
  0x7f   :  { %v61_v17 = vmul.f32 %v2018_v10, %v52_v16 }
  0x81   :  { %v63_v18 = vsub.f32 %v43_v2, %v61_v17 }
  0x83   :  { %v65_v19 = vmul.f32 %v63_v18, %v63_v18 }
  0x85   :  { %v69_v20 = vsel %vm46_vm0, %v65_v19, 0.0 }
  0x86   :  { %70 = vadd.xlane.f32.xlu1 %v69_v20 }
  0xf1   :  { %v68_v24 = vpop.xlane.xlu1 %67 }
  0xf2   :  { %v72_v25 = vmul.f32 %v68_v24, %v2018_v10 }
  0xf4   :  { %v74_v29 = vadd.f32 1e-12, %v72_v25 }
  0xf6   :  { %1862 = vrsqrt.f32 %v74_v29  ;;  %vm82_vm3 = vweird.f32 %v74_v29 }
  0xf9   :  { %v71_v30 = vpop.xlane.xlu1 %70 }
  0xfa   :  { %v73_v31 = vmul.f32 %v71_v30, %v2018_v10 }
  0xfc   :  { %v1863_v32 = vpop.eup %1862  ;;  %v75_v33 = vadd.f32 1e-12, %v73_v31 }
  0xfd   :  { %v77_v34 = vmul.f32 %v1863_v32, %v74_v29  ;;  %vm83_vm2 = vweird.f32 %v1863_v32 }
  0xfe   :  { %1864 = vrsqrt.f32 %v75_v33  ;;  %vm84_vm4 = vmor %vm82_vm3, %vm83_vm2  ;;  %vm92_vm6 = vweird.f32 %v75_v33  ;;  %vm729_vm2 = vcmask 523264  }
  0xff   :  { %v78_v35 = vmul.f32 %v1863_v32, %v77_v34 }
 0x101   :  { %v79_v36 = vmul.f32 0.5, %v78_v35  ;;  %v336_v35 = vperm.slane %v2067_v56, 1 }
 0x103   :  { %v80_v37 = vsub.f32 1.5, %v79_v36  ;;  %v368_v36 = vperm.slane %v2067_v56, 3 }
 0x104   :  { %v1865_v38 = vpop.eup %1864 }
 0x105   :  { %v81_v39 = vmul.f32 %v1863_v32, %v80_v37  ;;  %v87_v40 = vmul.f32 %v1865_v38, %v75_v33  ;;  %vm93_vm5 = vweird.f32 %v1865_v38 }
 0x106   :  { %vm94_vm7 = vmor %vm92_vm6, %vm93_vm5 }
 0x107   :  { %v88_v41 = vmul.f32 %v1865_v38, %v87_v40  ;;  %v85_v42 = vsel %vm84_vm4, %v1863_v32, %v81_v39 }
 0x108   :  { %v96_v46 = vmul.f32 %v85_v42, %v62_v13 }
 0x109   :  { %v89_v43 = vmul.f32 0.5, %v88_v41 }
 0x10a   :  { %v101_v50 = vmul.f32 %v1855_v45, %v96_v46 }
 0x10b   :  { %v90_v44 = vsub.f32 1.5, %v89_v43 }
 0x10c   :  { %v2050_v53 = vadd.f32 %v1856_v49, %v101_v50 }
 0x10d   :  { %v91_v47 = vmul.f32 %v1865_v38, %v90_v44 }
 0x10f   :  { %v95_v48 = vsel %vm94_vm7, %v1865_v38, %v91_v47 }
 0x110   :  { %v97_v51 = vmul.f32 %v95_v48, %v63_v18  ;;  %v1820_v18 = vld [vmem:[%s2367_s4 + $0x30] sm:$0xff] }
 0x112   :  { %v102_v52 = vmul.f32 %v1855_v45, %v97_v51 }
 0x114   :  { %v2052_v54 = vadd.f32 %v1856_v49, %v102_v52 }
 0x116   :  { %v2056_v55 = vpack.c.bf16 %v2052_v54, %v2050_v53 }
 0x118   :  { %1550 = vmatmul.msk.bf16.vlgmr.msra.gmra.mxu0 %vm46_vm0, %v2056_v55  ;;  %1563 = vmatmul.msk.bf16.vlgmr.msra.gmra.mxu1 %vm46_vm0, %v2056_v55 }
 0x119   :  { %1576 = vmatmul.msk.bf16.vlgmr.msra.gmra.mxu2 %vm46_vm0, %v2056_v55 }
 0x195   :  { %v172_v58 = vpop.f32.mrf.mxu1  ;;  %v140_v60 = vpop.f32.mrf.mxu0 }
 0x196   :  { %v173_v59 = vadd.f32 %v172_v58, %v150_v57  ;;  %v141_v2 = vadd.f32 %v140_v60, %v115_v61 }
 0x198   :  { %v211_v62 = vpack.c.bf16 %v173_v59, %v173_v59  ;;  %v209_v9 = vpack.c.bf16 %v141_v2, %v141_v2 }
 0x19a   :  { %v220_v1 = vsel %vm215_vm8, %v211_v62, 0 }
 0x19b   :  { %229 = vmatpush.bf16.xpose.msra.mxu3 %v220_v1 }
 0x19c   :  { %v204_v3 = vpop.f32.mrf.mxu2 }
 0x19d   :  { %v205_v5 = vadd.f32 %v204_v3, %v182_v0  ;;  %v174_v6 = vpop.f32.mrf.mxu1  ;;  %v142_v13 = vpop.f32.mrf.mxu0 }
 0x19e   :  { %v175_v7 = vadd.f32 %v174_v6, %v150_v57  ;;  %v143_v16 = vadd.f32 %v142_v13, %v115_v61  ;;  %v1822_v6 = vld [vmem:[%s2367_s4 + $0x50] sm:$0xff] }
 0x19f   :  { %v213_v8 = vpack.c.bf16 %v205_v5, %v205_v5  ;;  %v1823_v5 = vld [vmem:[%s2367_s4 + $0x58] sm:$0xff] }
 0x1a0   :  { %v212_v11 = vpack.c.bf16 %v175_v7, %v175_v7  ;;  %v210_v21 = vpack.c.bf16 %v143_v16, %v143_v16 }
 0x1a1   :  { %v294_v14 = vsel %vm292_vm9, %v213_v8, 0 }
 0x1a2   :  { %303 = vmatpush.bf16.msrb.mxu1 %v294_v14  ;;  %1577 = vmatmul.msk.bf16.vlgmr.msra.gmra.mxu3 %vm215_vm8, %v209_v9  ;;  %v239_v15 = vsel %vm215_vm8, %v212_v11, 0 }
 0x1a3   :  { %355 = vmatpush.bf16.msrb.mxu3 %v1819_v63  ;;  %248 = vmatpush.bf16.xpose.msrb.mxu0 %v239_v15 }
 0x1a4   :  { %v206_v17 = vpop.f32.mrf.mxu2 }
 0x1a5   :  { %v207_v19 = vadd.f32 %v206_v17, %v182_v0  ;;  %v1817_v17 = vld [vmem:[%s2368_s5] sm:$0xff] }
 0x1a6   :  { %419 = vmatpush.bf16.msra.mxu1 %v1823_v5 }
 0x1a7   :  { %356 = vmatpush.bf16.msrb.mxu3 %v1818_v4  ;;  %v214_v20 = vpack.c.bf16 %v207_v19, %v207_v19 }
 0x1a9   :  { %v313_v22 = vsel %vm292_vm9, %v214_v20, 0 }
 0x1aa   :  { %322 = vmatpush.bf16.msrb.mxu2 %v313_v22  ;;  %1578 = vmatmul.msk.bf16.vlgmr.msrb.gmra.mxu0 %vm215_vm8, %v210_v21  ;;  %v400_v22 = vperm.slane %v2067_v56, 5 }
 0x1ab   :  { %387 = vmatpush.bf16.msra.mxu0 %v1821_v12  ;;  %420 = vmatpush.bf16.msra.mxu1 %v1822_v6 }
 0x1af   :  { %388 = vmatpush.bf16.msra.mxu0 %v1820_v18 }
 0x1b2   :  { %1593 = vmatmul.msk.bf16.vlgmr.msrb.gmra.mxu3 %vm46_vm0, %v2056_v55 }
 0x1ba   :  { %1606 = vmatmul.msk.bf16.vlgmr.msra.gmra.mxu0 %vm46_vm0, %v2056_v55 }
 0x225   :  { %v231_v24 = vpop.f32.mrf.mxu3 }
 0x226   :  { %v254_v25 = vmul.f32 0.25, %v231_v24 }
 0x227   :  { %v250_v27 = vpop.f32.mrf.mxu0 }
 0x228   :  { %v255_v28 = vmul.f32 0.25, %v250_v27  ;;  %v262_v29 = vadd.f32 %v2097_v23, %v254_v25 }
 0x22a   :  { %v265_v30 = vsel %vm264_vm10, %v262_v29, -inf  ;;  %v263_v31 = vadd.f32 %v2102_v26, %v255_v28 }
 0x22b   :  { %266 = vmax.xlane.f32.xlu0 %v265_v30 }
 0x22c   :  { %v268_v32 = vsel %vm264_vm10, %v263_v31, -inf }
 0x22d   :  { %v233_v33 = vpop.f32.mrf.mxu3  ;;  %269 = vmax.xlane.f32.xlu2 %v268_v32 }
 0x22f   :  { %v252_v34 = vpop.f32.mrf.mxu0 }
 0x235   :  { %v358_v37 = vpop.f32.mrf.mxu3 }
 0x236   :  { %v359_v38 = vadd.f32 %v358_v37, %v336_v35 }
 0x237   :  { %v390_v39 = vpop.f32.mrf.mxu0 }
 0x238   :  { %v391_v40 = vadd.f32 %v390_v39, %v368_v36  ;;  %v427_v16 = vpack.c.bf16 %v359_v38, %v359_v38 }
 0x23a   :  { %v429_v41 = vpack.c.bf16 %v391_v40, %v391_v40 }
 0x23c   :  { %v437_v42 = vsel %vm215_vm8, %v429_v41, 0 }
 0x23d   :  { %446 = vmatpush.bf16.xpose.msra.mxu2 %v437_v42  ;;  %v360_v46 = vpop.f32.mrf.mxu3 }
 0x23e   :  { %v361_v48 = vadd.f32 %v360_v46, %v336_v35 }
 0x23f   :  { %v392_v43 = vpop.f32.mrf.mxu0 }
 0x240   :  { %v393_v44 = vadd.f32 %v392_v43, %v368_v36  ;;  %v428_v49 = vpack.c.bf16 %v361_v48, %v361_v48 }
 0x242   :  { %v430_v45 = vpack.c.bf16 %v393_v44, %v393_v44 }
 0x244   :  { %v456_v47 = vsel %vm215_vm8, %v430_v45, 0 }
 0x245   :  { %465 = vmatpush.bf16.xpose.msra.mxu3 %v456_v47 }
 0x24c   :  { %1621 = vmatmul.msk.bf16.vlgmr.msra.gmra.mxu3 %vm215_vm8, %v428_v49 }
 0x24d   :  { %580 = vmatpush.bf16.msrb.mxu3 %v1817_v17 }
 0x29e   :  { %v267_v50 = vpop.xlane.xlu0 %266 }
 0x29f   :  { %v271_v51 = vsub.f32 %v262_v29, %v267_v50 }
 0x2a0   :  { %v270_v52 = vpop.xlane.xlu2 %269 }
 0x2a1   :  { %v273_v57 = vmul.f32 1.442695, %v271_v51  ;;  %v272_v58 = vsub.f32 %v263_v31, %v270_v52  ;;  %v1824_v52 = vld [vmem:[%s2368_s5 + $0x8] sm:$0xff] }
 0x2a3   :  { %1866 = vpow2.f32 %v273_v57  ;;  %v275_v59 = vmul.f32 1.442695, %v272_v58 }
 0x2a5   :  { %1868 = vpow2.f32 %v275_v59 }
 0x2a9   :  { %v1867_v60 = vpop.eup %1866 }
 0x2aa   :  { %v277_v61 = vsel %vm264_vm10, %v1867_v60, 0.0 }
 0x2ab   :  { %v1869_v62 = vpop.eup %1868  ;;  %278 = vadd.xlane.f32.xlu1 %v277_v61 }
 0x2ac   :  { %v280_v63 = vsel %vm264_vm10, %v1869_v62, 0.0 }
 0x2ad   :  { %281 = vadd.xlane.f32.xlu2 %v280_v63 }
 0x2cf   :  { %v467_v0 = vpop.f32.mrf.mxu3 }
 0x2d0   :  { %v472_v1 = vmul.f32 0.25, %v467_v0 }
 0x2d2   :  { %v474_v2 = vadd.f32 %v2102_v26, %v472_v1 }
 0x2d4   :  { %v478_v3 = vsel %vm264_vm10, %v474_v2, -inf }
 0x2d5   :  { %479 = vmax.xlane.f32.xlu0 %v478_v3  ;;  %v587_v3 = vperm.slane %v2067_v56, 6 }
 0x2d7   :  { %v469_v4 = vpop.f32.mrf.mxu3 }
 0x31e   :  { %v279_v7 = vpop.xlane.xlu1 %278 }
 0x31f   :  { %1870 = vrcp.f32 %v279_v7 }
 0x320   :  { %v282_v8 = vpop.xlane.xlu2 %281 }
 0x321   :  { %1872 = vrcp.f32 %v282_v8 }
 0x325   :  { %v1871_v9 = vpop.eup %1870 }
 0x326   :  { %v285_v11 = vmul.f32 %v1871_v9, %v1867_v60 }
 0x327   :  { %v1873_v12 = vpop.eup %1872 }
 0x328   :  { %v286_v13 = vmul.f32 %v1873_v12, %v1869_v62  ;;  %v287_v14 = vpack.c.bf16 %v285_v11, %v285_v11 }
 0x32a   :  { %1579 = vmatmul.msk.bf16.vlgmr.msrb.gmra.mxu1 %vm264_vm10, %v287_v14  ;;  %v288_v15 = vpack.c.bf16 %v286_v13, %v286_v13 }
 0x32c   :  { %1580 = vmatmul.msk.bf16.vlgmr.msrb.gmra.mxu2 %vm264_vm10, %v288_v15 }
 0x32d   :  { %557 = vmatpush.bf16.msrb.mxu2 %v1824_v52 }
 0x33a   :  { %1619 = vmatmul.msk.bf16.vlgmr.msra.gmra.mxu1 %vm46_vm0, %v2056_v55 }
 0x33c   :  { %1620 = vmatmul.msk.bf16.vlgmr.msra.gmra.mxu2 %vm215_vm8, %v427_v16 }
 0x348   :  { %v480_v27 = vpop.xlane.xlu0 %479 }
 0x349   :  { %v482_v29 = vsub.f32 %v474_v2, %v480_v27 }
 0x34b   :  { %v485_v31 = vmul.f32 1.442695, %v482_v29  ;;  %v1825_v29 = vld [vmem:[%s2369_s6] sm:$0xff] }
 0x34d   :  { %1874 = vpow2.f32 %v485_v31 }
 0x353   :  { %v1875_v41 = vpop.eup %1874 }
 0x354   :  { %v490_v42 = vsel %vm264_vm10, %v1875_v41, 0.0 }
 0x3a7   :  { %v305_v18 = vpop.f32.mrf.mxu1 }
 0x3af   :  { %v307_v19 = vpop.f32.mrf.mxu1  ;;  %v324_v20 = vpop.f32.mrf.mxu2 }
 0x3b0   :  { %v328_v21 = vpack.c.bf16 %v324_v20, %v305_v18 }
 0x3b2   :  { %1635 = vmatmul.msk.bf16.vlgmr.msrb.gmra.mxu3 %vm215_vm8, %v328_v21 }
 0x3b7   :  { %v326_v24 = vpop.f32.mrf.mxu2  ;;  %v422_v25 = vpop.f32.mrf.mxu1 }
 0x3b8   :  { %v423_v28 = vadd.f32 %v422_v25, %v400_v22 }
 0x3ba   :  { %v431_v55 = vpack.c.bf16 %v423_v28, %v423_v28 }
 0x3bc   :  { %v503_v30 = vsel %vm292_vm9, %v431_v55, 0 }
 0x3bd   :  { %512 = vmatpush.bf16.msrb.mxu0 %v503_v30 }
 0x3bf   :  { %v424_v32 = vpop.f32.mrf.mxu1  ;;  %v448_v33 = vpop.f32.mrf.mxu2 }
 0x3c0   :  { %v425_v34 = vadd.f32 %v424_v32, %v400_v22  ;;  %v471_v35 = vmul.f32 0.25, %v448_v33 }
 0x3c2   :  { %v432_v36 = vpack.c.bf16 %v425_v34, %v425_v34  ;;  %v473_v37 = vadd.f32 %v2097_v23, %v471_v35 }
 0x3c4   :  { %v522_v38 = vsel %vm292_vm9, %v432_v36, 0  ;;  %v475_v39 = vsel %vm264_vm10, %v473_v37, -inf }
 0x3c5   :  { %476 = vmax.xlane.f32.xlu2 %v475_v39  ;;  %531 = vmatpush.bf16.msrb.mxu1 %v522_v38 }
 0x3c7   :  { %v450_v40 = vpop.f32.mrf.mxu2 }
 0x3cd   :  { %491 = vadd.xlane.f32.xlu2 %v490_v42  ;;  %v2165_v42 = vld [vmem:[%s2371_s8 + $0x8] sm:$0xff] }
 0x435   :  { %v582_v2 = vpop.f32.mrf.mxu3 }
 0x438   :  { %v477_v43 = vpop.xlane.xlu2 %476 }
 0x439   :  { %v481_v44 = vsub.f32 %v473_v37, %v477_v43 }
 0x43b   :  { %v483_v45 = vmul.f32 1.442695, %v481_v44 }
 0x43d   :  { %1876 = vpow2.f32 %v483_v45  ;;  %v584_v9 = vpop.f32.mrf.mxu3 }
 0x440   :  { %v492_v46 = vpop.xlane.xlu2 %491 }
 0x441   :  { %1878 = vrcp.f32 %v492_v46  ;;  %v636_v46 = vperm.slane %v2165_v42, 1 }
 0x443   :  { %v1877_v47 = vpop.eup %1876 }
 0x444   :  { %v487_v48 = vsel %vm264_vm10, %v1877_v47, 0.0 }
 0x445   :  { %488 = vadd.xlane.f32.xlu1 %v487_v48 }
 0x447   :  { %v1879_v49 = vpop.eup %1878 }
 0x448   :  { %v496_v50 = vmul.f32 %v1879_v49, %v1875_v41 }
 0x44a   :  { %v498_v51 = vpack.c.bf16 %v496_v50, %v496_v50  ;;  %v639_v50 = vperm.slane %v2165_v42, 2 }
 0x44c   :  { %1623 = vmatmul.msk.bf16.vlgmr.msrb.gmra.mxu1 %vm264_vm10, %v498_v51 }
 0x4b8   :  { %v489_v57 = vpop.xlane.xlu1 %488 }
 0x4b9   :  { %1880 = vrcp.f32 %v489_v57 }
 0x4bf   :  { %v1881_v58 = vpop.eup %1880 }
 0x4c0   :  { %v495_v59 = vmul.f32 %v1881_v58, %v1877_v47 }
 0x4c2   :  { %v497_v60 = vpack.c.bf16 %v495_v59, %v495_v59 }
 0x4c4   :  { %1622 = vmatmul.msk.bf16.vlgmr.msrb.gmra.mxu0 %vm264_vm10, %v497_v60 }
 0x4c9   :  { %v533_v61 = vpop.f32.mrf.mxu1 }
 0x4d1   :  { %v535_v62 = vpop.f32.mrf.mxu1 }
 0x4d2   :  { %v1829_v62 = vld [vmem:[%s2370_s7 + $0x10] sm:$0xff] }
 0x541   :  { %v514_v63 = vpop.f32.mrf.mxu0 }
 0x542   :  { %v537_v0 = vpack.c.bf16 %v533_v61, %v514_v63  ;;  %v1830_v61 = vld [vmem:[%s2370_s7 + $0x18] sm:$0xff]  ;;  %v1828_v63 = vld [vmem:[%s2370_s7 + $0x8] sm:$0xff] }
 0x543   :  { %737 = vmatpush.bf16.msra.mxu1 %v1830_v61 }
 0x544   :  { %1630 = vmatmul.msk.bf16.vlgmr.msrb.gmra.mxu2 %vm215_vm8, %v537_v0  ;;  %v647_v0 = vperm.slane %v2067_v56, 7 }
 0x547   :  { %738 = vmatpush.bf16.msra.mxu1 %v1829_v62 }
 0x549   :  { %v516_v1 = vpop.f32.mrf.mxu0 }
 0x54b   :  { %739 = vmatpush.bf16.msra.mxu1 %v1828_v63 }
 0x5c7   :  { %v559_v4 = vpop.f32.mrf.mxu2 }
 0x5c8   :  { %v583_v5 = vadd.f32 %v582_v2, %v559_v4  ;;  %v1827_v2 = vld [vmem:[%s2370_s7] sm:$0xff] }
 0x5c9   :  { %740 = vmatpush.bf16.msra.mxu1 %v1827_v2 }
 0x5ca   :  { %v588_v6 = vadd.f32 %v587_v3, %v583_v5 }
 0x5cc   :  { %v590_v7 = vadd.f32 %v588_v6, %v2050_v53 }
 0x5ce   :  { %v592_v8 = vsel %vm46_vm0, %v590_v7, 0.0 }
 0x5cf   :  { %593 = vadd.xlane.f32.xlu0 %v592_v8  ;;  %v561_v11 = vpop.f32.mrf.mxu2 }
 0x5d0   :  { %v585_v12 = vadd.f32 %v584_v9, %v561_v11 }
 0x5d2   :  { %v589_v13 = vadd.f32 %v587_v3, %v585_v12 }
 0x5d4   :  { %v591_v14 = vadd.f32 %v589_v13, %v2052_v54  ;;  %v1826_v54 = vld [vmem:[%s2369_s6 + $0x8] sm:$0xff] }
 0x5d5   :  { %669 = vmatpush.bf16.msra.mxu0 %v1826_v54 }
 0x5d6   :  { %v595_v15 = vsel %vm46_vm0, %v591_v14, 0.0 }
 0x5d7   :  { %596 = vadd.xlane.f32.xlu1 %v595_v15 }
 0x5d9   :  { %670 = vmatpush.bf16.msra.mxu0 %v1825_v29 }
 0x642   :  { %v594_v16 = vpop.xlane.xlu0 %593 }
 0x643   :  { %v598_v17 = vmul.f32 %v594_v16, %v2018_v10 }
 0x645   :  { %v600_v18 = vsub.f32 %v590_v7, %v598_v17 }
 0x647   :  { %v602_v19 = vmul.f32 %v600_v18, %v600_v18 }
 0x649   :  { %v604_v20 = vsel %vm46_vm0, %v602_v19, 0.0 }
 0x64a   :  { %605 = vadd.xlane.f32.xlu2 %v604_v20  ;;  %v597_v53 = vpop.xlane.xlu1 %596 }
 0x64b   :  { %v599_v21 = vmul.f32 %v597_v53, %v2018_v10 }
 0x64d   :  { %v601_v22 = vsub.f32 %v591_v14, %v599_v21 }
 0x64f   :  { %v603_v24 = vmul.f32 %v601_v22, %v601_v22 }
 0x651   :  { %v607_v25 = vsel %vm46_vm0, %v603_v24, 0.0 }
 0x652   :  { %608 = vadd.xlane.f32.xlu0 %v607_v25  ;;  %v704_v25 = vperm.slane %v2165_v42, 0 }
 0x6bd   :  { %v606_v27 = vpop.xlane.xlu2 %605 }
 0x6be   :  { %v610_v28 = vmul.f32 %v606_v27, %v2018_v10 }
 0x6c0   :  { %v612_v55 = vadd.f32 1e-12, %v610_v28 }
 0x6c2   :  { %1882 = vrsqrt.f32 %v612_v55  ;;  %vm620_vm12 = vweird.f32 %v612_v55 }
 0x6c5   :  { %v609_v30 = vpop.xlane.xlu0 %608 }
 0x6c6   :  { %v611_v31 = vmul.f32 %v609_v30, %v2018_v10 }
 0x6c8   :  { %v1883_v32 = vpop.eup %1882  ;;  %v613_v33 = vadd.f32 1e-12, %v611_v31 }
 0x6c9   :  { %v615_v34 = vmul.f32 %v1883_v32, %v612_v55  ;;  %vm621_vm11 = vweird.f32 %v1883_v32 }
 0x6ca   :  { %1884 = vrsqrt.f32 %v613_v33  ;;  %vm622_vm13 = vmor %vm620_vm12, %vm621_vm11  ;;  %vm630_vm15 = vweird.f32 %v613_v33 }
 0x6cb   :  { %v616_v35 = vmul.f32 %v1883_v32, %v615_v34 }
 0x6cd   :  { %v617_v36 = vmul.f32 0.5, %v616_v35 }
 0x6cf   :  { %v618_v37 = vsub.f32 1.5, %v617_v36 }
 0x6d0   :  { %v1885_v38 = vpop.eup %1884 }
 0x6d1   :  { %v619_v39 = vmul.f32 %v1883_v32, %v618_v37  ;;  %v625_v40 = vmul.f32 %v1885_v38, %v613_v33  ;;  %vm631_vm14 = vweird.f32 %v1885_v38 }
 0x6d2   :  { %vm632_vm1 = vmor %vm630_vm15, %vm631_vm14 }
 0x6d3   :  { %v626_v41 = vmul.f32 %v1885_v38, %v625_v40  ;;  %v623_v43 = vsel %vm622_vm13, %v1883_v32, %v619_v39 }
 0x6d4   :  { %v634_v47 = vmul.f32 %v623_v43, %v600_v18 }
 0x6d5   :  { %v627_v44 = vmul.f32 0.5, %v626_v41 }
 0x6d6   :  { %v637_v51 = vmul.f32 %v636_v46, %v634_v47 }
 0x6d7   :  { %v628_v45 = vsub.f32 1.5, %v627_v44  ;;  %v1832_v44 = vld [vmem:[%s2367_s4 + $0x68] sm:$0xff] }
 0x6d8   :  { %v640_v58 = vadd.f32 %v639_v50, %v637_v51  ;;  %830 = vmatpush.bf16.msra.mxu2 %v1832_v44  ;;  %v1833_v51 = vld [vmem:[%s2367_s4 + $0x80] sm:$0xff] }
 0x6d9   :  { %v629_v48 = vmul.f32 %v1885_v38, %v628_v45  ;;  %v1834_v45 = vld [vmem:[%s2367_s4 + $0x88] sm:$0xff] }
 0x6da   :  { %862 = vmatpush.bf16.msra.mxu3 %v1834_v45 }
 0x6db   :  { %v633_v49 = vsel %vm632_vm1, %v1885_v38, %v629_v48 }
 0x6dc   :  { %v635_v52 = vmul.f32 %v633_v49, %v601_v22 }
 0x6de   :  { %v638_v57 = vmul.f32 %v636_v46, %v635_v52  ;;  %v1836_v46 = vld [vmem:[%s2367_s4 + $0xa8] sm:$0xff]  ;;  %v1835_v52 = vld [vmem:[%s2367_s4 + $0xa0] sm:$0xff]  ;;  %863 = vmatpush.bf16.msra.mxu3 %v1833_v51 }
 0x6df   :  { %894 = vmatpush.bf16.msrb.mxu0 %v1836_v46  ;;  %v1840_v46 = vld [vmem:[%s2367_s4 + $0x90] sm:$0xff] }
 0x6e0   :  { %v641_v59 = vadd.f32 %v639_v50, %v638_v57  ;;  %v1831_v50 = vld [vmem:[%s2367_s4 + $0x60] sm:$0xff] }
 0x6e1   :  { %831 = vmatpush.bf16.msra.mxu2 %v1831_v50 }
 0x6e2   :  { %v642_v60 = vpack.c.bf16 %v641_v59, %v640_v58 }
 0x6e3   :  { %895 = vmatpush.bf16.msrb.mxu0 %v1835_v52 }
 0x6e4   :  { %1644 = vmatmul.msk.bf16.vlgmr.msra.gmra.mxu0 %vm46_vm0, %v642_v60 }
 0x761   :  { %v672_v1 = vpop.f32.mrf.mxu0 }
 0x762   :  { %v673_v3 = vadd.f32 %v672_v1, %v647_v0 }
 0x764   :  { %v677_v4 = vmul.f32 %v673_v3, %v673_v3 }
 0x766   :  { %v679_v5 = vmul.f32 %v677_v4, %v673_v3 }
 0x768   :  { %v681_v6 = vmul.f32 0.044715, %v679_v5 }
 0x769   :  { %v674_v7 = vpop.f32.mrf.mxu0 }
 0x76a   :  { %v683_v8 = vadd.f32 %v681_v6, %v673_v3  ;;  %v675_v9 = vadd.f32 %v674_v7, %v647_v0 }
 0x76c   :  { %v685_v11 = vmul.f32 0.7978846, %v683_v8  ;;  %v678_v12 = vmul.f32 %v675_v9, %v675_v9  ;;  %v793_v8 = vperm.slane %v2165_v42, 3 }
 0x76e   :  { %v680_v13 = vmul.f32 %v678_v12, %v675_v9  ;;  %1886 = vtanh.f32 %v685_v11 }
 0x770   :  { %v682_v14 = vmul.f32 0.044715, %v680_v13  ;;  %v796_v13 = vperm.slane %v2165_v42, 4  ;;  %v2230_v42 = vld [vmem:[%s2371_s8 + $0x10] sm:$0xff] }
 0x772   :  { %v684_v56 = vadd.f32 %v682_v14, %v675_v9 }
 0x774   :  { %v686_v15 = vmul.f32 0.7978846, %v684_v56  ;;  %v1887_v16 = vpop.eup %1886 }
 0x775   :  { %v689_v17 = vadd.f32 1.0, %v1887_v16 }
 0x776   :  { %1888 = vtanh.f32 %v686_v15 }
 0x777   :  { %v691_v19 = vmul.f32 0.5, %v689_v17 }
 0x779   :  { %v693_v21 = vmul.f32 %v691_v19, %v673_v3  ;;  %v875_v19 = vperm.slane %v2230_v42, 4 }
 0x77c   :  { %v1889_v18 = vpop.eup %1888 }
 0x77d   :  { %v690_v20 = vadd.f32 1.0, %v1889_v18 }
 0x77f   :  { %v692_v53 = vmul.f32 0.5, %v690_v20 }
 0x781   :  { %v694_v22 = vmul.f32 %v692_v53, %v675_v9 }
 0x783   :  { %v695_v24 = vpack.c.bf16 %v694_v22, %v693_v21  ;;  %v843_v21 = vperm.slane %v2230_v42, 2 }
 0x785   :  { %1661 = vmatmul.msk.bf16.vlgmr.msra.gmra.mxu1 %vm729_vm2, %v695_v24 }
 0x802   :  { %v742_v54 = vpop.f32.mrf.mxu1 }
 0x803   :  { %v743_v27 = vadd.f32 %v742_v54, %v704_v25 }
 0x805   :  { %v747_v28 = vadd.f32 %v743_v27, %v640_v58 }
 0x807   :  { %v749_v55 = vsel %vm46_vm0, %v747_v28, 0.0 }
 0x808   :  { %750 = vadd.xlane.f32.xlu1 %v749_v55 }
 0x80a   :  { %v744_v29 = vpop.f32.mrf.mxu1 }
 0x80b   :  { %v745_v30 = vadd.f32 %v744_v29, %v704_v25 }
 0x80d   :  { %v748_v31 = vadd.f32 %v745_v30, %v641_v59  ;;  %v1839_v30 = vld [vmem:[%s2367_s4 + $0x78] sm:$0xff] }
 0x80f   :  { %v752_v32 = vsel %vm46_vm0, %v748_v31, 0.0 }
 0x810   :  { %753 = vadd.xlane.f32.xlu2 %v752_v32 }
 0x87b   :  { %v751_v33 = vpop.xlane.xlu1 %750 }
 0x87c   :  { %v755_v34 = vmul.f32 %v751_v33, %v2018_v10 }
 0x87e   :  { %v757_v35 = vsub.f32 %v747_v28, %v755_v34  ;;  %v808_v28 = vperm.slane %v2230_v42, 0 }
 0x880   :  { %v759_v36 = vmul.f32 %v757_v35, %v757_v35 }
 0x882   :  { %v761_v37 = vsel %vm46_vm0, %v759_v36, 0.0 }
 0x883   :  { %v754_v38 = vpop.xlane.xlu2 %753  ;;  %762 = vadd.xlane.f32.xlu0 %v761_v37 }
 0x884   :  { %v756_v39 = vmul.f32 %v754_v38, %v2018_v10 }
 0x886   :  { %v758_v40 = vsub.f32 %v748_v31, %v756_v39 }
 0x888   :  { %v760_v41 = vmul.f32 %v758_v40, %v758_v40 }
 0x88a   :  { %v764_v43 = vsel %vm46_vm0, %v760_v41, 0.0  ;;  %v1841_v41 = vld [vmem:[%s2367_s4 + $0x98] sm:$0xff] }
 0x88b   :  { %765 = vadd.xlane.f32.xlu1 %v764_v43 }
 0x8f6   :  { %v763_v47 = vpop.xlane.xlu0 %762 }
 0x8f7   :  { %v767_v48 = vmul.f32 %v763_v47, %v2018_v10 }
 0x8f9   :  { %v769_v49 = vadd.f32 1e-12, %v767_v48 }
 0x8fb   :  { %1890 = vrsqrt.f32 %v769_v49  ;;  %vm777_vm4 = vweird.f32 %v769_v49 }
 0x8fe   :  { %v766_v57 = vpop.xlane.xlu1 %765 }
 0x8ff   :  { %v768_v58 = vmul.f32 %v766_v57, %v2018_v10  ;;  %v1021_v57 = vperm.slane %v2230_v42, 1 }
 0x901   :  { %v1891_v59 = vpop.eup %1890  ;;  %v770_v60 = vadd.f32 1e-12, %v768_v58 }
 0x902   :  { %v772_v61 = vmul.f32 %v1891_v59, %v769_v49  ;;  %vm778_vm3 = vweird.f32 %v1891_v59 }
 0x903   :  { %1892 = vrsqrt.f32 %v770_v60  ;;  %vm779_vm5 = vmor %vm777_vm4, %vm778_vm3  ;;  %vm787_vm7 = vweird.f32 %v770_v60 }
 0x904   :  { %v773_v62 = vmul.f32 %v1891_v59, %v772_v61 }
 0x906   :  { %v774_v63 = vmul.f32 0.5, %v773_v62 }
 0x908   :  { %v775_v0 = vsub.f32 1.5, %v774_v63 }
 0x909   :  { %v1893_v1 = vpop.eup %1892 }
 0x90a   :  { %v776_v2 = vmul.f32 %v1891_v59, %v775_v0  ;;  %v782_v3 = vmul.f32 %v1893_v1, %v770_v60  ;;  %vm788_vm6 = vweird.f32 %v1893_v1 }
 0x90b   :  { %vm789_vm11 = vmor %vm787_vm7, %vm788_vm6 }
 0x90c   :  { %v783_v4 = vmul.f32 %v1893_v1, %v782_v3  ;;  %v780_v5 = vsel %vm779_vm5, %v1891_v59, %v776_v2 }
 0x90d   :  { %v791_v9 = vmul.f32 %v780_v5, %v757_v35  ;;  %v1838_v35 = vld [vmem:[%s2367_s4 + $0x70] sm:$0xff] }
 0x90e   :  { %v784_v6 = vmul.f32 0.5, %v783_v4 }
 0x90f   :  { %v794_v14 = vmul.f32 %v793_v8, %v791_v9 }
 0x910   :  { %v785_v7 = vsub.f32 1.5, %v784_v6 }
 0x911   :  { %v2213_v16 = vadd.f32 %v796_v13, %v794_v14 }
 0x912   :  { %v786_v11 = vmul.f32 %v1893_v1, %v785_v7 }
 0x914   :  { %v790_v12 = vsel %vm789_vm11, %v1893_v1, %v786_v11  ;;  %v1053_v1 = vperm.slane %v2230_v42, 3 }
 0x915   :  { %v792_v56 = vmul.f32 %v790_v12, %v758_v40 }
 0x917   :  { %v795_v15 = vmul.f32 %v793_v8, %v792_v56 }
 0x919   :  { %v2215_v17 = vadd.f32 %v796_v13, %v795_v15 }
 0x91b   :  { %v2219_v18 = vpack.c.bf16 %v2215_v17, %v2213_v16 }
 0x91d   :  { %1676 = vmatmul.msk.bf16.vlgmr.msra.gmra.mxu2 %vm46_vm0, %v2219_v18  ;;  %1689 = vmatmul.msk.bf16.vlgmr.msra.gmra.mxu3 %vm46_vm0, %v2219_v18 }
 0x91e   :  { %1702 = vmatmul.msk.bf16.vlgmr.msrb.gmra.mxu0 %vm46_vm0, %v2219_v18 }
 0x99b   :  { %v897_v20 = vpop.f32.mrf.mxu0 }
 0x99c   :  { %v898_v53 = vadd.f32 %v897_v20, %v875_v19 }
 0x99e   :  { %v906_v22 = vpack.c.bf16 %v898_v53, %v898_v53 }
 0x9a0   :  { %v978_v24 = vsel %vm292_vm9, %v906_v22, 0  ;;  %v865_v25 = vpop.f32.mrf.mxu3  ;;  %v833_v27 = vpop.f32.mrf.mxu2 }
 0x9a1   :  { %v866_v54 = vadd.f32 %v865_v25, %v843_v21  ;;  %987 = vmatpush.bf16.msrb.mxu3 %v978_v24  ;;  %v834_v34 = vadd.f32 %v833_v27, %v808_v28 }
 0x9a3   :  { %v904_v55 = vpack.c.bf16 %v866_v54, %v866_v54  ;;  %v899_v29 = vpop.f32.mrf.mxu0  ;;  %v902_v39 = vpack.c.bf16 %v834_v34, %v834_v34 }
 0x9a4   :  { %v900_v31 = vadd.f32 %v899_v29, %v875_v19 }
 0x9a5   :  { %v912_v32 = vsel %vm215_vm8, %v904_v55, 0 }
 0x9a6   :  { %v907_v33 = vpack.c.bf16 %v900_v31, %v900_v31  ;;  %921 = vmatpush.bf16.xpose.msrb.mxu1 %v912_v32  ;;  %v1842_v31 = vld [vmem:[%s2367_s4 + $0xb0] sm:$0xff] }
 0x9a8   :  { %v997_v36 = vsel %vm292_vm9, %v907_v33, 0  ;;  %v867_v37 = vpop.f32.mrf.mxu3  ;;  %v835_v43 = vpop.f32.mrf.mxu2 }
 0x9a9   :  { %v868_v38 = vadd.f32 %v867_v37, %v843_v21  ;;  %1006 = vmatpush.bf16.msra.mxu0 %v997_v36  ;;  %v836_v45 = vadd.f32 %v835_v43, %v808_v28 }
 0x9ab   :  { %v905_v40 = vpack.c.bf16 %v868_v38, %v868_v38  ;;  %v903_v47 = vpack.c.bf16 %v836_v45, %v836_v45 }
 0x9ad   :  { %v931_v44 = vsel %vm215_vm8, %v905_v40, 0  ;;  %1703 = vmatmul.msk.bf16.vlgmr.msrb.gmra.mxu1 %vm215_vm8, %v902_v39  ;;  %v1837_v40 = vld [vmem:[%s2368_s5 + $0x10] sm:$0xff] }
 0x9ae   :  { %1040 = vmatpush.bf16.msra.mxu1 %v1839_v30  ;;  %940 = vmatpush.bf16.xpose.msrb.mxu2 %v931_v44  ;;  %v1843_v30 = vld [vmem:[%s2367_s4 + $0xb8] sm:$0xff] }
 0x9af   :  { %1104 = vmatpush.bf16.msra.mxu3 %v1843_v30 }
 0x9b2   :  { %1041 = vmatpush.bf16.msra.mxu1 %v1838_v35 }
 0x9b3   :  { %1105 = vmatpush.bf16.msra.mxu3 %v1842_v31 }
 0x9b5   :  { %1704 = vmatmul.msk.bf16.vlgmr.msrb.gmra.mxu2 %vm215_vm8, %v903_v47 }
 0x9b6   :  { %1072 = vmatpush.bf16.msra.mxu2 %v1841_v41 }
 0x9ba   :  { %1073 = vmatpush.bf16.msra.mxu2 %v1840_v46  ;;  %v1085_v46 = vperm.slane %v2230_v42, 5 }
 0x9bd   :  { %1721 = vmatmul.msk.bf16.vlgmr.msra.gmra.mxu1 %vm46_vm0, %v2219_v18 }
 0x9c5   :  { %1734 = vmatmul.msk.bf16.vlgmr.msra.gmra.mxu2 %vm46_vm0, %v2219_v18 }
 0xa2a   :  { %v923_v48 = vpop.f32.mrf.mxu1 }
 0xa2b   :  { %v946_v49 = vmul.f32 0.25, %v923_v48 }
 0xa2d   :  { %v948_v50 = vadd.f32 %v2097_v23, %v946_v49 }
 0xa2f   :  { %v950_v51 = vsel %vm264_vm10, %v948_v50, -inf }
 0xa30   :  { %951 = vmax.xlane.f32.xlu1 %v950_v51 }
 0xa32   :  { %v925_v52 = vpop.f32.mrf.mxu1 }
 0xa38   :  { %v942_v58 = vpop.f32.mrf.mxu2 }
 0xa39   :  { %v947_v59 = vmul.f32 0.25, %v942_v58 }
 0xa3a   :  { %v1043_v60 = vpop.f32.mrf.mxu1 }
 0xa3b   :  { %v1044_v61 = vadd.f32 %v1043_v60, %v1021_v57  ;;  %v949_v62 = vadd.f32 %v2102_v26, %v947_v59 }
 0xa3d   :  { %v953_v63 = vsel %vm264_vm10, %v949_v62, -inf  ;;  %v1112_v39 = vpack.c.bf16 %v1044_v61, %v1044_v61 }
 0xa3e   :  { %954 = vmax.xlane.f32.xlu2 %v953_v63 }
 0xa40   :  { %v944_v0 = vpop.f32.mrf.mxu2 }
 0xa42   :  { %v1045_v9 = vpop.f32.mrf.mxu1 }
 0xa43   :  { %v1046_v12 = vadd.f32 %v1045_v9, %v1021_v57 }
 0xa45   :  { %v1113_v13 = vpack.c.bf16 %v1046_v12, %v1046_v12 }
 0xa48   :  { %v1075_v2 = vpop.f32.mrf.mxu2 }
 0xa49   :  { %v1076_v3 = vadd.f32 %v1075_v2, %v1053_v1 }
 0xa4b   :  { %v1114_v4 = vpack.c.bf16 %v1076_v3, %v1076_v3 }
 0xa4d   :  { %v1122_v5 = vsel %vm215_vm8, %v1114_v4, 0 }
 0xa4e   :  { %1131 = vmatpush.bf16.xpose.msrb.mxu0 %v1122_v5 }
 0xa50   :  { %v1077_v6 = vpop.f32.mrf.mxu2 }
 0xa51   :  { %v1078_v7 = vadd.f32 %v1077_v6, %v1053_v1 }
 0xa53   :  { %v1115_v8 = vpack.c.bf16 %v1078_v7, %v1078_v7 }
 0xa55   :  { %v1141_v11 = vsel %vm215_vm8, %v1115_v8, 0 }
 0xa56   :  { %1150 = vmatpush.bf16.xpose.msrb.mxu1 %v1141_v11 }
 0xa5d   :  { %1749 = vmatmul.msk.bf16.vlgmr.msrb.gmra.mxu1 %vm215_vm8, %v1113_v13 }
 0xa5e   :  { %1265 = vmatpush.bf16.msra.mxu1 %v1837_v40 }
 0xaa3   :  { %v952_v14 = vpop.xlane.xlu1 %951 }
 0xaa4   :  { %v956_v56 = vsub.f32 %v948_v50, %v952_v14  ;;  %v1844_v14 = vld [vmem:[%s2368_s5 + $0x18] sm:$0xff] }
 0xaa6   :  { %v958_v15 = vmul.f32 1.442695, %v956_v56 }
 0xaa8   :  { %1894 = vpow2.f32 %v958_v15 }
 0xaae   :  { %v1895_v19 = vpop.eup %1894 }
 0xaaf   :  { %v962_v20 = vsel %vm264_vm10, %v1895_v19, 0.0 }
 0xab0   :  { %963 = vadd.xlane.f32.xlu2 %v962_v20 }
 0xab1   :  { %v955_v53 = vpop.xlane.xlu2 %954 }
 0xab2   :  { %v957_v21 = vsub.f32 %v949_v62, %v955_v53 }
 0xab4   :  { %v960_v22 = vmul.f32 1.442695, %v957_v21 }
 0xab6   :  { %1896 = vpow2.f32 %v960_v22 }
 0xabc   :  { %v1897_v24 = vpop.eup %1896 }
 0xabd   :  { %v965_v25 = vsel %vm264_vm10, %v1897_v24, 0.0 }
 0xabe   :  { %966 = vadd.xlane.f32.xlu0 %v965_v25 }
 0xada   :  { %v1152_v54 = vpop.f32.mrf.mxu1 }
 0xadb   :  { %v1157_v27 = vmul.f32 0.25, %v1152_v54 }
 0xadd   :  { %v1159_v28 = vadd.f32 %v2102_v26, %v1157_v27  ;;  %v1272_v27 = vperm.slane %v2230_v42, 6 }
 0xadf   :  { %v1163_v55 = vsel %vm264_vm10, %v1159_v28, -inf }
 0xae0   :  { %1164 = vmax.xlane.f32.xlu1 %v1163_v55 }
 0xae2   :  { %v1154_v29 = vpop.f32.mrf.mxu1 }
 0xb23   :  { %v964_v32 = vpop.xlane.xlu2 %963 }
 0xb24   :  { %1898 = vrcp.f32 %v964_v32 }
 0xb2a   :  { %v1899_v33 = vpop.eup %1898 }
 0xb2b   :  { %v970_v34 = vmul.f32 %v1899_v33, %v1895_v19 }
 0xb2d   :  { %v972_v35 = vpack.c.bf16 %v970_v34, %v970_v34 }
 0xb2f   :  { %1705 = vmatmul.msk.bf16.vlgmr.msrb.gmra.mxu3 %vm264_vm10, %v972_v35 }
 0xb31   :  { %v967_v26 = vpop.xlane.xlu0 %966 }
 0xb32   :  { %1900 = vrcp.f32 %v967_v26 }
 0xb38   :  { %v1901_v36 = vpop.eup %1900 }
 0xb39   :  { %v971_v37 = vmul.f32 %v1901_v36, %v1897_v24 }
 0xb3b   :  { %v973_v38 = vpack.c.bf16 %v971_v37, %v971_v37 }
 0xb3d   :  { %1706 = vmatmul.msk.bf16.vlgmr.msra.gmra.mxu0 %vm264_vm10, %v973_v38 }
 0xb3e   :  { %1242 = vmatpush.bf16.msra.mxu0 %v1844_v14 }
 0xb3f   :  { %1747 = vmatmul.msk.bf16.vlgmr.msra.gmra.mxu3 %vm46_vm0, %v2219_v18 }
 0xb4d   :  { %1748 = vmatmul.msk.bf16.vlgmr.msrb.gmra.mxu0 %vm215_vm8, %v1112_v39 }
 0xb53   :  { %v1165_v49 = vpop.xlane.xlu1 %1164 }
 0xb54   :  { %v1167_v51 = vsub.f32 %v1159_v28, %v1165_v49 }
 0xb56   :  { %v1170_v57 = vmul.f32 1.442695, %v1167_v51 }
 0xb58   :  { %1902 = vpow2.f32 %v1170_v57 }
 0xb5e   :  { %v1903_v3 = vpop.eup %1902 }
 0xb5f   :  { %v1175_v4 = vsel %vm264_vm10, %v1903_v3, 0.0 }
 0xbb2   :  { %v989_v41 = vpop.f32.mrf.mxu3 }
 0xbba   :  { %v991_v43 = vpop.f32.mrf.mxu3  ;;  %v1008_v44 = vpop.f32.mrf.mxu0 }
 0xbbb   :  { %v1012_v45 = vpack.c.bf16 %v1008_v44, %v989_v41 }
 0xbbd   :  { %1763 = vmatmul.msk.bf16.vlgmr.msra.gmra.mxu1 %vm215_vm8, %v1012_v45 }
 0xbc2   :  { %v1010_v47 = vpop.f32.mrf.mxu0  ;;  %v1107_v48 = vpop.f32.mrf.mxu3 }
 0xbc3   :  { %v1108_v18 = vadd.f32 %v1107_v48, %v1085_v46 }
 0xbc5   :  { %v1116_v50 = vpack.c.bf16 %v1108_v18, %v1108_v18  ;;  %v1845_v18 = vld [vmem:[%s2369_s6 + $0x10] sm:$0xff] }
 0xbc7   :  { %v1188_v52 = vsel %vm292_vm9, %v1116_v50, 0 }
 0xbc8   :  { %1197 = vmatpush.bf16.msrb.mxu2 %v1188_v52 }
 0xbca   :  { %v1109_v58 = vpop.f32.mrf.mxu3  ;;  %v1133_v59 = vpop.f32.mrf.mxu0 }
 0xbcb   :  { %v1110_v60 = vadd.f32 %v1109_v58, %v1085_v46  ;;  %v1156_v61 = vmul.f32 0.25, %v1133_v59 }
 0xbcd   :  { %v1117_v62 = vpack.c.bf16 %v1110_v60, %v1110_v60  ;;  %v1158_v63 = vadd.f32 %v2097_v23, %v1156_v61 }
 0xbcf   :  { %v1207_v0 = vsel %vm292_vm9, %v1117_v62, 0  ;;  %v1160_v1 = vsel %vm264_vm10, %v1158_v63, -inf }
 0xbd0   :  { %1216 = vmatpush.bf16.msrb.mxu3 %v1207_v0  ;;  %1161 = vmax.xlane.f32.xlu0 %v1160_v1 }
 0xbd2   :  { %v1135_v2 = vpop.f32.mrf.mxu0 }
 0xbd3   :  { %v2318_v2 = vld [vmem:[%s2371_s8 + $0x18] sm:$0xff] }
 0xbd8   :  { %1176 = vadd.xlane.f32.xlu0 %v1175_v4 }
 0xc3a   :  { %v1267_v54 = vpop.f32.mrf.mxu1 }
 0xc42   :  { %v1269_v32 = vpop.f32.mrf.mxu1 }
 0xc43   :  { %v1162_v5 = vpop.xlane.xlu0 %1161 }
 0xc44   :  { %v1166_v6 = vsub.f32 %v1158_v63, %v1162_v5 }
 0xc46   :  { %v1168_v7 = vmul.f32 1.442695, %v1166_v6  ;;  %v1321_v6 = vperm.slane %v2318_v2, 1 }
 0xc48   :  { %1904 = vpow2.f32 %v1168_v7 }
 0xc4b   :  { %v1177_v8 = vpop.xlane.xlu0 %1176 }
 0xc4c   :  { %1906 = vrcp.f32 %v1177_v8 }
 0xc4e   :  { %v1905_v9 = vpop.eup %1904 }
 0xc4f   :  { %v1172_v23 = vsel %vm264_vm10, %v1905_v9, 0.0 }
 0xc50   :  { %1173 = vadd.xlane.f32.xlu2 %v1172_v23  ;;  %v1324_v23 = vperm.slane %v2318_v2, 2 }
 0xc52   :  { %v1907_v11 = vpop.eup %1906 }
 0xc53   :  { %v1181_v12 = vmul.f32 %v1907_v11, %v1903_v3 }
 0xc55   :  { %v1183_v13 = vpack.c.bf16 %v1181_v12, %v1181_v12 }
 0xc57   :  { %1751 = vmatmul.msk.bf16.vlgmr.msrb.gmra.mxu3 %vm264_vm10, %v1183_v13 }
 0xcc3   :  { %v1174_v56 = vpop.xlane.xlu2 %1173 }
 0xcc4   :  { %1908 = vrcp.f32 %v1174_v56 }
 0xcca   :  { %v1909_v15 = vpop.eup %1908 }
 0xccb   :  { %v1180_v19 = vmul.f32 %v1909_v15, %v1905_v9 }
 0xccd   :  { %v1182_v20 = vpack.c.bf16 %v1180_v19, %v1180_v19  ;;  %v1850_v19 = vld [vmem:[%s2370_s7 + $0x38] sm:$0xff] }
 0xcce   :  { %1423 = vmatpush.bf16.msra.mxu3 %v1850_v19 }
 0xccf   :  { %1750 = vmatmul.msk.bf16.vlgmr.msrb.gmra.mxu2 %vm264_vm10, %v1182_v20  ;;  %v1849_v20 = vld [vmem:[%s2370_s7 + $0x30] sm:$0xff] }
 0xcd2   :  { %1424 = vmatpush.bf16.msra.mxu3 %v1849_v20  ;;  %v1479_v20 = vperm.slane %v2318_v2, 3 }
 0xcda   :  { %v1218_v53 = vpop.f32.mrf.mxu3 }
 0xce2   :  { %v1220_v21 = vpop.f32.mrf.mxu3 }
 0xce3   :  { %v1333_v21 = vperm.slane %v2230_v42, 7 }
 0xd52   :  { %v1199_v22 = vpop.f32.mrf.mxu2 }
 0xd53   :  { %v1222_v24 = vpack.c.bf16 %v1218_v53, %v1199_v22  ;;  %v1848_v53 = vld [vmem:[%s2370_s7 + $0x28] sm:$0xff] }
 0xd54   :  { %1425 = vmatpush.bf16.msra.mxu3 %v1848_v53 }
 0xd55   :  { %1758 = vmatmul.msk.bf16.vlgmr.msra.gmra.mxu0 %vm215_vm8, %v1222_v24  ;;  %v1847_v24 = vld [vmem:[%s2370_s7 + $0x20] sm:$0xff] }
 0xd58   :  { %1426 = vmatpush.bf16.msra.mxu3 %v1847_v24 }
 0xd5a   :  { %v1201_v25 = vpop.f32.mrf.mxu2 }
 0xdd2   :  { %v1244_v28 = vpop.f32.mrf.mxu0 }
 0xdd3   :  { %v1268_v55 = vadd.f32 %v1267_v54, %v1244_v28 }
 0xdd5   :  { %v1273_v29 = vadd.f32 %v1272_v27, %v1268_v55 }
 0xdd7   :  { %v1275_v30 = vadd.f32 %v1273_v29, %v2213_v16 }
 0xdd9   :  { %v1277_v31 = vsel %vm46_vm0, %v1275_v30, 0.0 }
 0xdda   :  { %1278 = vadd.xlane.f32.xlu1 %v1277_v31  ;;  %v1246_v33 = vpop.f32.mrf.mxu0 }
 0xddb   :  { %v1270_v34 = vadd.f32 %v1269_v32, %v1246_v33 }
 0xddd   :  { %v1274_v35 = vadd.f32 %v1272_v27, %v1270_v34 }
 0xddf   :  { %v1276_v26 = vadd.f32 %v1274_v35, %v2215_v17  ;;  %v1846_v17 = vld [vmem:[%s2369_s6 + $0x18] sm:$0xff] }
 0xde0   :  { %1355 = vmatpush.bf16.msra.mxu2 %v1846_v17 }
 0xde1   :  { %v1280_v36 = vsel %vm46_vm0, %v1276_v26, 0.0 }
 0xde2   :  { %1281 = vadd.xlane.f32.xlu2 %v1280_v36 }
 0xde4   :  { %1356 = vmatpush.bf16.msra.mxu2 %v1845_v18 }
 0xe4d   :  { %v1279_v37 = vpop.xlane.xlu1 %1278 }
 0xe4e   :  { %v1283_v38 = vmul.f32 %v1279_v37, %v2018_v10 }
 0xe50   :  { %v1285_v39 = vsub.f32 %v1275_v30, %v1283_v38 }
 0xe52   :  { %v1287_v40 = vmul.f32 %v1285_v39, %v1285_v39 }
 0xe54   :  { %v1289_v41 = vsel %vm46_vm0, %v1287_v40, 0.0 }
 0xe55   :  { %1290 = vadd.xlane.f32.xlu0 %v1289_v41  ;;  %v1282_v16 = vpop.xlane.xlu2 %1281 }
 0xe56   :  { %v1284_v43 = vmul.f32 %v1282_v16, %v2018_v10 }
 0xe58   :  { %v1286_v44 = vsub.f32 %v1276_v26, %v1284_v43 }
 0xe5a   :  { %v1288_v45 = vmul.f32 %v1286_v44, %v1286_v44 }
 0xe5c   :  { %v1292_v46 = vsel %vm46_vm0, %v1288_v45, 0.0 }
 0xe5d   :  { %1293 = vadd.xlane.f32.xlu1 %v1292_v46 }
 0xec8   :  { %v1291_v47 = vpop.xlane.xlu0 %1290 }
 0xec9   :  { %v1295_v48 = vmul.f32 %v1291_v47, %v2018_v10 }
 0xecb   :  { %v1297_v49 = vadd.f32 1e-12, %v1295_v48 }
 0xecd   :  { %1910 = vrsqrt.f32 %v1297_v49  ;;  %vm1305_vm9 = vweird.f32 %v1297_v49 }
 0xed0   :  { %v1294_v50 = vpop.xlane.xlu1 %1293 }
 0xed1   :  { %v1296_v51 = vmul.f32 %v1294_v50, %v2018_v10 }
 0xed3   :  { %v1911_v52 = vpop.eup %1910  ;;  %v1298_v57 = vadd.f32 1e-12, %v1296_v51 }
 0xed4   :  { %v1300_v58 = vmul.f32 %v1911_v52, %v1297_v49  ;;  %vm1306_vm8 = vweird.f32 %v1911_v52 }
 0xed5   :  { %1912 = vrsqrt.f32 %v1298_v57  ;;  %vm1307_vm10 = vmor %vm1305_vm9, %vm1306_vm8  ;;  %vm1315_vm13 = vweird.f32 %v1298_v57 }
 0xed6   :  { %v1301_v59 = vmul.f32 %v1911_v52, %v1300_v58 }
 0xed8   :  { %v1302_v60 = vmul.f32 0.5, %v1301_v59 }
 0xeda   :  { %v1303_v61 = vsub.f32 1.5, %v1302_v60 }
 0xedb   :  { %v1913_v62 = vpop.eup %1912 }
 0xedc   :  { %v1304_v63 = vmul.f32 %v1911_v52, %v1303_v61  ;;  %v1310_v0 = vmul.f32 %v1913_v62, %v1298_v57  ;;  %vm1316_vm12 = vweird.f32 %v1913_v62 }
 0xedd   :  { %vm1317_vm14 = vmor %vm1315_vm13, %vm1316_vm12 }
 0xede   :  { %v1311_v1 = vmul.f32 %v1913_v62, %v1310_v0  ;;  %v1308_v3 = vsel %vm1307_vm10, %v1911_v52, %v1304_v63 }
 0xedf   :  { %v1319_v7 = vmul.f32 %v1308_v3, %v1285_v39 }
 0xee0   :  { %v1312_v4 = vmul.f32 0.5, %v1311_v1 }
 0xee1   :  { %v1322_v11 = vmul.f32 %v1321_v6, %v1319_v7 }
 0xee2   :  { %v1313_v5 = vsub.f32 1.5, %v1312_v4 }
 0xee3   :  { %v1325_v14 = vadd.f32 %v1324_v23, %v1322_v11 }
 0xee4   :  { %v1314_v8 = vmul.f32 %v1913_v62, %v1313_v5  ;;  %v1852_v5 = vld [vmem:[%s2372_s9 + $0x8] sm:$0xff] }
 0xee5   :  { %1518 = vmatpush.bf16.msrb.mxu0 %v1852_v5 }
 0xee6   :  { %v1318_v9 = vsel %vm1317_vm14, %v1913_v62, %v1314_v8 }
 0xee7   :  { %v1320_v12 = vmul.f32 %v1318_v9, %v1286_v44  ;;  %v1391_v44 = vperm.slane %v2318_v2, 0 }
 0xee9   :  { %v1323_v13 = vmul.f32 %v1321_v6, %v1320_v12  ;;  %v1851_v6 = vld [vmem:[%s2372_s9] sm:$0xff] }
 0xeea   :  { %1519 = vmatpush.bf16.msrb.mxu0 %v1851_v6 }
 0xeeb   :  { %v1326_v56 = vadd.f32 %v1324_v23, %v1323_v13 }
 0xeed   :  { %v1327_v15 = vpack.c.bf16 %v1326_v56, %v1325_v14 }
 0xeef   :  { %1776 = vmatmul.msk.bf16.vlgmr.msra.gmra.mxu2 %vm46_vm0, %v1327_v15 }
 0xf72   :  { %v1358_v22 = vpop.f32.mrf.mxu2 }
 0xf73   :  { %v1359_v25 = vadd.f32 %v1358_v22, %v1333_v21 }
 0xf75   :  { %v1363_v54 = vmul.f32 %v1359_v25, %v1359_v25 }
 0xf77   :  { %v1365_v27 = vmul.f32 %v1363_v54, %v1359_v25 }
 0xf79   :  { %v1367_v28 = vmul.f32 0.044715, %v1365_v27 }
 0xf7a   :  { %v1360_v55 = vpop.f32.mrf.mxu2 }
 0xf7b   :  { %v1369_v29 = vadd.f32 %v1367_v28, %v1359_v25  ;;  %v1361_v30 = vadd.f32 %v1360_v55, %v1333_v21 }
 0xf7d   :  { %v1371_v31 = vmul.f32 0.7978846, %v1369_v29  ;;  %v1364_v32 = vmul.f32 %v1361_v30, %v1361_v30 }
 0xf7f   :  { %v1366_v33 = vmul.f32 %v1364_v32, %v1361_v30  ;;  %1914 = vtanh.f32 %v1371_v31 }
 0xf81   :  { %v1368_v34 = vmul.f32 0.044715, %v1366_v33 }
 0xf83   :  { %v1370_v42 = vadd.f32 %v1368_v34, %v1361_v30 }
 0xf85   :  { %v1372_v35 = vmul.f32 0.7978846, %v1370_v42  ;;  %v1915_v26 = vpop.eup %1914 }
 0xf86   :  { %v1375_v36 = vadd.f32 1.0, %v1915_v26 }
 0xf87   :  { %1916 = vtanh.f32 %v1372_v35 }
 0xf88   :  { %v1377_v38 = vmul.f32 0.5, %v1375_v36 }
 0xf8a   :  { %v1379_v41 = vmul.f32 %v1377_v38, %v1359_v25 }
 0xf8d   :  { %v1917_v37 = vpop.eup %1916 }
 0xf8e   :  { %v1376_v39 = vadd.f32 1.0, %v1917_v37 }
 0xf90   :  { %v1378_v40 = vmul.f32 0.5, %v1376_v39 }
 0xf92   :  { %v1380_v16 = vmul.f32 %v1378_v40, %v1361_v30 }
 0xf94   :  { %v1381_v43 = vpack.c.bf16 %v1380_v16, %v1379_v41 }
 0xf96   :  { %1801 = vmatmul.msk.bf16.vlgmr.msra.gmra.mxu3 %vm729_vm2, %v1381_v43 }
0x1019   :  { %v1428_v45 = vpop.f32.mrf.mxu3 }
0x101a   :  { %v1429_v46 = vadd.f32 %v1428_v45, %v1391_v44 }
0x101c   :  { %v1433_v17 = vadd.f32 %v1429_v46, %v1325_v14 }
0x101e   :  { %v1435_v47 = vsel %vm46_vm0, %v1433_v17, 0.0 }
0x101f   :  { %1436 = vadd.xlane.f32.xlu2 %v1435_v47 }
0x1021   :  { %v1430_v48 = vpop.f32.mrf.mxu3 }
0x1022   :  { %v1431_v49 = vadd.f32 %v1430_v48, %v1391_v44 }
0x1024   :  { %v1434_v18 = vadd.f32 %v1431_v49, %v1326_v56 }
0x1026   :  { %v1438_v50 = vsel %vm46_vm0, %v1434_v18, 0.0 }
0x1027   :  { %1439 = vadd.xlane.f32.xlu0 %v1438_v50 }
0x1092   :  { %v1437_v51 = vpop.xlane.xlu2 %1436 }
0x1093   :  { %v1441_v52 = vmul.f32 %v1437_v51, %v2018_v10 }
0x1095   :  { %v1443_v57 = vsub.f32 %v1433_v17, %v1441_v52 }
0x1097   :  { %v1445_v58 = vmul.f32 %v1443_v57, %v1443_v57 }
0x1099   :  { %v1447_v59 = vsel %vm46_vm0, %v1445_v58, 0.0 }
0x109a   :  { %v1440_v60 = vpop.xlane.xlu0 %1439  ;;  %1448 = vadd.xlane.f32.xlu1 %v1447_v59 }
0x109b   :  { %v1442_v61 = vmul.f32 %v1440_v60, %v2018_v10 }
0x109d   :  { %v1444_v62 = vsub.f32 %v1434_v18, %v1442_v61 }
0x109f   :  { %v1446_v63 = vmul.f32 %v1444_v62, %v1444_v62 }
0x10a1   :  { %v1450_v0 = vsel %vm46_vm0, %v1446_v63, 0.0 }
0x10a2   :  { %1451 = vadd.xlane.f32.xlu2 %v1450_v0 }
0x110d   :  { %v1449_v1 = vpop.xlane.xlu1 %1448 }
0x110e   :  { %v1453_v3 = vmul.f32 %v1449_v1, %v2018_v10 }
0x1110   :  { %v1455_v4 = vadd.f32 1e-12, %v1453_v3 }
0x1112   :  { %1918 = vrsqrt.f32 %v1455_v4  ;;  %vm1463_vm1 = vweird.f32 %v1455_v4 }
0x1115   :  { %v1452_v7 = vpop.xlane.xlu2 %1451 }
0x1116   :  { %v1454_v8 = vmul.f32 %v1452_v7, %v2018_v10  ;;  %v1482_v10 = vperm.slane %v2318_v2, 4  ;;  %v1859_v2 = vld [vmem:[%s2373_s10] ss:$0 sm:$0xff] }
0x1118   :  { %v1919_v9 = vpop.eup %1918  ;;  %v1456_v23 = vadd.f32 1e-12, %v1454_v8 }
0x1119   :  { %v1458_v11 = vmul.f32 %v1919_v9, %v1455_v4  ;;  %vm1464_vm15 = vweird.f32 %v1919_v9 }
0x111a   :  { %1920 = vrsqrt.f32 %v1456_v23  ;;  %vm1465_vm2 = vmor %vm1463_vm1, %vm1464_vm15  ;;  %vm1473_vm4 = vweird.f32 %v1456_v23 }
0x111b   :  { %v1459_v12 = vmul.f32 %v1919_v9, %v1458_v11 }
0x111d   :  { %v1460_v13 = vmul.f32 0.5, %v1459_v12 }
0x111f   :  { %v1461_v14 = vsub.f32 1.5, %v1460_v13 }
0x1120   :  { %v1921_v56 = vpop.eup %1920 }
0x1121   :  { %v1462_v15 = vmul.f32 %v1919_v9, %v1461_v14  ;;  %v1468_v19 = vmul.f32 %v1921_v56, %v1456_v23  ;;  %vm1474_vm3 = vweird.f32 %v1921_v56 }
0x1122   :  { %vm1475_vm5 = vmor %vm1473_vm4, %vm1474_vm3 }
0x1123   :  { %v1466_v53 = vsel %vm1465_vm2, %v1919_v9, %v1462_v15  ;;  %v1469_v21 = vmul.f32 %v1921_v56, %v1468_v19 }
0x1124   :  { %v1477_v22 = vmul.f32 %v1466_v53, %v1443_v57 }
0x1125   :  { %v1470_v24 = vmul.f32 0.5, %v1469_v21 }
0x1126   :  { %v1480_v25 = vmul.f32 %v1479_v20, %v1477_v22 }
0x1127   :  { %v1471_v54 = vsub.f32 1.5, %v1470_v24 }
0x1128   :  { %v1483_v27 = vadd.f32 %v1482_v10, %v1480_v25 }
0x1129   :  { %v1472_v28 = vmul.f32 %v1921_v56, %v1471_v54 }
0x112a   :  { %1485 = vst.msk [vmem:[#allocation2] sm:$0xff] %vm46_vm0, %v1483_v27 }
0x112b   :  { %v1476_v55 = vsel %vm1475_vm5, %v1921_v56, %v1472_v28 }
0x112c   :  { %v1478_v29 = vmul.f32 %v1476_v55, %v1444_v62 }
0x112e   :  { %v1481_v30 = vmul.f32 %v1479_v20, %v1478_v29 }
0x1130   :  { %v1484_v31 = vadd.f32 %v1482_v10, %v1481_v30 }
0x1132   :  { %1486 = vst.msk [vmem:[#allocation2 + $0x8] sm:$0xff] %vm46_vm0, %v1484_v31 }
0x1139   :  { %v1487_v32 = vld [vmem:[#allocation2] ss:$8 sm:$0x3] }
0x113a   :  { %v1488_v33 = vpack.c.bf16 %v1487_v32, %v1487_v32 }
0x113c   :  { %1810 = vmatmul.msk.bf16.vlgmr.msrb.gmra.mxu0 %vm46_vm0, %v1488_v33 }
0x11b9   :  { %v1521_v34 = vpop.f32.mrf.mxu0 }
0x11ba   :  { %v1522_v42 = vadd.f32 %v1859_v2, %v1521_v34 }
0x11bc   :  { %1525 = vst [vmem:[#allocation3] sm:$0x3] %v1522_v42 }
0x11bd   :  { %1536 = dma.vmem_to_hbm [thread:$0]  %s1532_s26, 32, %s1534_s28, [#allocation4]  }
0x11c1   :  { %v1523_v35 = vpop.f32.mrf.mxu0 }
0x11c2   :  { %1946 = dma.done.wait [#allocation4], 32  }
0x11c3   :  { %1947 = vsyncadd [#allocation4], 4294967264 }
0x11c4   :  { %1541 = vsyncpa [#allocation4], 1 }

</bundles_post_ra>
